<compile_context>
chip_gen: v7x
topology: tpu7x:2x2x1
jax: 0.10.0
libtpu: 0.0.40
codegen_flags: <defaults>
</compile_context>

<pallas_src>
import functools
import math

import jax
import jax.numpy as jnp
from jax.experimental import pallas as pl
from jax.experimental.pallas import tpu as pltpu


def _round_up(x, m):
    return (x + m - 1) // m * m


def bigmodel_kernel(alpha_ref,                 # SMEM (2,)  : PReLU alphas
                    g_ref, x_ref,              # (TILE_M,TILE_K) G tile, (TILE_K,F_P) X tile
                    wf_ref, bf_ref,            # folded Linear:  W_fold (bf16), b_fold (f32)
                    w2_ref, b2_ref,            # projection[2]:  W2 (bf16), b2 (f32)
                    out_ref,                   # (TILE_M, C_P) f32
                    acc_ref,                   # VMEM scratch (TILE_M, F_P) f32
                    *, n_k, tile_k, need_k_mask):
    k = pl.program_id(1)

    @pl.when(k == 0)
    def _init():
        acc_ref[...] = jnp.zeros_like(acc_ref)

    # G streamed straight from HBM in its native dtype; cast to bf16 for the MXU.
    g = g_ref[...].astype(jnp.bfloat16)
    if need_k_mask:
        # Last K block reads past the end of G; zero the invalid columns so the
        # contraction is exact (X's padded rows are already exact zeros).
        col = jax.lax.broadcasted_iota(jnp.int32, g.shape, 1)
        g = jnp.where(col < (n_k - k * tile_k), g, 0)

    # acc += G_tile @ X_tile   (bf16 MXU inputs, f32 accumulation)
    acc_ref[...] += jnp.dot(g, x_ref[...], preferred_element_type=jnp.float32)

    # Epilogue only on the last K step:
    #   h1 = (G@X) @ (W_node @ W1) + (b_node @ W1 + b1);  PReLU
    #   h2 = h1 @ W2 + b2;                                 PReLU
    @pl.when(k == pl.num_programs(1) - 1)
    def _epilogue():
        gx = acc_ref[...].astype(jnp.bfloat16)
        h1 = jnp.dot(gx, wf_ref[...], preferred_element_type=jnp.float32) + bf_ref[...]
        h1 = jnp.where(h1 > 0, h1, alpha_ref[0] * h1)              # PReLU (single alpha)
        h2 = jnp.dot(h1.astype(jnp.bfloat16), w2_ref[...],
                     preferred_element_type=jnp.float32) + b2_ref[...]
        out_ref[...] = jnp.where(h2 > 0, h2, alpha_ref[1] * h2)    # PReLU


def bigmodel_forward(G, X, params, *, tile_m=512, tile_k=2048,
                     vmem_limit_bytes=48 * 1024 * 1024):
    """G: [N, N] adjacency-like, X: [N, n_feat]. Returns [N, n_classes] f32."""
    wn, bn, w1, b1, a1, w2, b2, a2 = params
    N, F = X.shape
    assert G.shape == (N, N)
    hid = w1.shape[1]
    n_classes = w2.shape[1]

    # ---- algebraic fold of node_module linear into projection[0] ------------
    #   ((G@X)@wn + bn) @ w1 + b1  ==  (G@X) @ (wn@w1) + (bn@w1 + b1)
    w_fold = wn @ w1                      # [F, hid]
    b_fold = bn @ w1 + b1                 # [1, hid]

    # ---- lane-dense padding of feature dims to multiples of 128 -------------
    F_P = _round_up(F, 128)
    H_P = _round_up(hid, 128)
    C_P = _round_up(n_classes, 128)

    # ---- tile selection -------------------------------------------------------
    tile_m = _round_up(max(int(tile_m), 8), 8)          # f32/bf16 sublane multiple
    tile_k = _round_up(max(int(tile_k), 128), 128)      # lane multiple for G blocks
    # Keep >=~16 row blocks for large N so both v7x TensorCores get steady-state
    # pipeline work, but never go below a 128-row tile.
    tm_target = max(_round_up(pl.cdiv(N, 16), 8), 128)
    TILE_M = max(8, min(tile_m, _round_up(N, 8), tm_target))
    TILE_K = N if tile_k >= N else tile_k                # full-K (= full dim) or 128-multiple
    grid = (pl.cdiv(N, TILE_M), pl.cdiv(N, TILE_K))
    need_k_mask = (N % TILE_K) != 0

    # ---- operand prep.  G is passed through UNTOUCHED (no pad/cast pre-pass). --
    NK_P = grid[1] * TILE_K                              # X rows padded with exact zeros
    Xp  = jnp.pad(X, ((0, NK_P - N), (0, F_P - F))).astype(jnp.bfloat16)
    wf  = jnp.pad(w_fold, ((0, F_P - F), (0, H_P - hid))).astype(jnp.bfloat16)
    bf_ = jnp.pad(b_fold, ((0, 0), (0, H_P - hid))).astype(jnp.float32)
    w2p = jnp.pad(w2, ((0, H_P - hid), (0, C_P - n_classes))).astype(jnp.bfloat16)
    b2p = jnp.pad(b2, ((0, 0), (0, C_P - n_classes))).astype(jnp.float32)
    # TODO(synk): single shared PReLU alpha (torch.nn.PReLU() default); per-channel
    # alphas (num_parameters=hid_dim) would need a lane-padded VMEM vector instead.
    alphas = jnp.concatenate([a1.reshape(-1), a2.reshape(-1)]).astype(jnp.float32)

    kernel = functools.partial(bigmodel_kernel, n_k=N, tile_k=TILE_K,
                               need_k_mask=need_k_mask)

    def _call(weight_pipeline_mode):
        def wspec(shape):
            if weight_pipeline_mode is None:
                return pl.BlockSpec(shape, lambda i, k: (0, 0))
            return pl.BlockSpec(shape, lambda i, k: (0, 0),
                                pipeline_mode=weight_pipeline_mode)

        return pl.pallas_call(
            kernel,
            out_shape=jax.ShapeDtypeStruct((N, C_P), jnp.float32),
            grid=grid,
            in_specs=[
                # PReLU alphas as SMEM scalars (no padded VMEM tile / DMA descriptor)
                pl.BlockSpec(memory_space=pltpu.MemorySpace.SMEM),
                # G streamed in (TILE_M, TILE_K) blocks (dominant HBM traffic)
                pl.BlockSpec((TILE_M, TILE_K), lambda i, k: (i, k)),
                # X streamed along K
                pl.BlockSpec((TILE_K, F_P), lambda i, k: (k, 0)),
                # grid-invariant folded weights / biases (single-buffered when supported)
                wspec((F_P, H_P)),
                wspec((1, H_P)),
                wspec((H_P, C_P)),
                wspec((1, C_P)),
            ],
            out_specs=pl.BlockSpec((TILE_M, C_P), lambda i, k: (i, 0)),
            scratch_shapes=[pltpu.VMEM((TILE_M, F_P), jnp.float32)],
            compiler_params=pltpu.CompilerParams(
                dimension_semantics=("parallel", "arbitrary"),  # rows shard across TCs
                vmem_limit_bytes=vmem_limit_bytes,
            ),
        )(alphas, G, Xp, wf, bf_, w2p, b2p)

    try:
        # Grid-invariant weight/bias operands don't need double buffering.
        out_padded = _call(pl.Buffered(1))
    except Exception:
        # Fallback for lowerings without pipeline_mode support (weights are tiny,
        # ~260 KiB double-buffered, so this costs nothing meaningful).
        out_padded = _call(None)

    return out_padded[:, :n_classes]


def xavier_uniform(key, fan_in, fan_out):
    # matches torch.nn.init.xavier_uniform_ (gain=1); stored as [in, out]
    bound = math.sqrt(6.0 / (fan_in + fan_out))
    return jax.random.uniform(key, (fan_in, fan_out), jnp.float32, -bound, bound)


def make_params(key, n_feat, n_classes, hid_dim):
    k0, k1, k2 = jax.random.split(key, 3)
    wn = xavier_uniform(k0, n_feat, n_classes)           # node_module weight
    bn = jnp.zeros((1, n_classes), jnp.float32)
    w1 = xavier_uniform(k1, n_classes, hid_dim)          # projection[0]
    b1 = jnp.zeros((1, hid_dim), jnp.float32)
    a1 = jnp.full((1, 1), 0.25, jnp.float32)             # PReLU alpha (torch default)
    w2 = xavier_uniform(k2, hid_dim, n_classes)          # projection[2]
    b2 = jnp.zeros((1, n_classes), jnp.float32)
    a2 = jnp.full((1, 1), 0.25, jnp.float32)
    return (wn, bn, w1, b1, a1, w2, b2, a2)


if __name__ == "__main__":
    key = jax.random.PRNGKey(0)
    kG, kX, kP = jax.random.split(key, 3)

    # Small, deliberately non-divisible shapes (partial row and K blocks exercised).
    N, n_feat, n_classes, hid_dim = 200, 16, 16, 32

    # Symmetric row-normalized adjacency-like matrix and node features.
    A = jax.random.uniform(kG, (N, N), jnp.float32)
    A = (A + A.T) * 0.5 + jnp.eye(N, dtype=jnp.float32)
    G = A / jnp.sum(A, axis=-1, keepdims=True)
    X = jax.random.normal(kX, (N, n_feat), jnp.float32)

    params = make_params(kP, n_feat, n_classes, hid_dim)

    # Pure-JAX f32 reference of the original (unfolded) module math.
    wn, bn, w1, b1, a1, w2, b2, a2 = params
    node = (G @ X) @ wn + bn
    h1 = node @ w1 + b1
    h1 = jnp.where(h1 > 0, h1, a1[0, 0] * h1)
    h2 = h1 @ w2 + b2
    ref = jnp.where(h2 > 0, h2, a2[0, 0] * h2)

    # Multi-block path: 4 row blocks x 2 K blocks, partial last K block (masked)
    # and partial last row block (write-masked).
    out_small = jax.block_until_ready(
        bigmodel_forward(G, X, params, tile_m=64, tile_k=128))
    # Default (large-tile) path: single K block, partial last row block.
    out_default = jax.block_until_ready(bigmodel_forward(G, X, params))

    assert out_small.shape == (N, n_classes)
    assert out_default.shape == (N, n_classes)
    # bf16 G/X/weight casts loosen the tolerance slightly vs. pure f32.
    err1 = float(jnp.max(jnp.abs(out_small - ref)))
    err2 = float(jnp.max(jnp.abs(out_default - ref)))
    assert err1 < 2e-2 and err2 < 2e-2, (err1, err2)

    # TODO(synk): graph_module branch / torch.cat is dead code in the reference
    # forward (it always returns projection(node)), so it is not implemented.
    print("KERNEL_OK")
</pallas_src>

<mosaic_0001>
module attributes {stable_mosaic.version = 11 : i64} {
  func.func @bigmodel_kernel(%arg0: i32, %arg1: i32, %arg2: memref<2xf32, #tpu.memory_space<smem>>, %arg3: memref<64x128xf32, #tpu.memory_space<vmem>>, %arg4: memref<128x128xbf16, #tpu.memory_space<vmem>>, %arg5: memref<128x128xbf16, #tpu.memory_space<vmem>>, %arg6: memref<1x128xf32, #tpu.memory_space<vmem>>, %arg7: memref<128x128xbf16, #tpu.memory_space<vmem>>, %arg8: memref<1x128xf32, #tpu.memory_space<vmem>>, %arg9: memref<64x128xf32, #tpu.memory_space<vmem>>, %arg10: memref<64x128xf32, #tpu.memory_space<vmem>>) attributes {dimension_semantics = [#tpu.dimension_semantics<parallel>, #tpu.dimension_semantics<arbitrary>], iteration_bounds = array<i64: 4, 2>, scalar_prefetch = 0 : i64, scratch_operands = 1 : i64, tpu.core_type = #tpu.core_type<tc>, window_params = [{transform_indices = @transform_0, window_bounds = array<i64: 2>}, {transform_indices = @transform_1, window_bounds = array<i64: 64, 128>}, {transform_indices = @transform_2, window_bounds = array<i64: 128, 128>}, {pipeline_mode = #tpu.pipeline_mode<synchronous>, transform_indices = @transform_3, window_bounds = array<i64: 128, 128>}, {pipeline_mode = #tpu.pipeline_mode<synchronous>, transform_indices = @transform_4, window_bounds = array<i64: 1, 128>}, {pipeline_mode = #tpu.pipeline_mode<synchronous>, transform_indices = @transform_5, window_bounds = array<i64: 128, 128>}, {pipeline_mode = #tpu.pipeline_mode<synchronous>, transform_indices = @transform_6, window_bounds = array<i64: 1, 128>}, {transform_indices = @transform_7, window_bounds = array<i64: 64, 128>}]} {
    %c0_i32 = arith.constant 0 : i32
    %0 = arith.cmpi eq, %arg1, %c0_i32 : i32
    %1 = arith.extui %0 : i1 to i32
    %c0_i32_0 = arith.constant 0 : i32
    %2 = arith.cmpi ne, %1, %c0_i32_0 : i32
    scf.if %2 {
      %cst_10 = arith.constant 0.000000e+00 : f32
      %21 = vector.broadcast %cst_10 : f32 to vector<64x128xf32>
      %c0_11 = arith.constant 0 : index
      %c0_12 = arith.constant 0 : index
      %22 = vector.load %arg10[%c0_11, %c0_12] : memref<64x128xf32, #tpu.memory_space<vmem>>, vector<64x128xf32>
      tpu.vector_store %arg10[%c0_11, %c0_12], %21 {strides = array<i32>} : memref<64x128xf32, #tpu.memory_space<vmem>>, vector<64x128xf32>,
    } else {
    }
    %c0 = arith.constant 0 : index
    %c0_1 = arith.constant 0 : index
    %3 = vector.load %arg3[%c0, %c0_1] : memref<64x128xf32, #tpu.memory_space<vmem>>, vector<64x128xf32>
    %4 = arith.truncf %3 : vector<64x128xf32> to vector<64x128xbf16>
    %5 = tpu.iota {dimensions = array<i32: 1>} : vector<64x128xi32>
    %c128_i32 = arith.constant 128 : i32
    %6 = arith.muli %arg1, %c128_i32 : i32
    %c200_i32 = arith.constant 200 : i32
    %7 = arith.subi %c200_i32, %6 : i32
    %8 = vector.broadcast %7 : i32 to vector<64x128xi32>
    %9 = arith.cmpi slt, %5, %8 : vector<64x128xi32>
    %c0_i32_2 = arith.constant 0 : i32
    %10 = arith.sitofp %c0_i32_2 : i32 to bf16
    %11 = vector.broadcast %10 : bf16 to vector<64x128xbf16>
    %12 = arith.select %9, %4, %11 : vector<64x128xi1>, vector<64x128xbf16>
    %c0_3 = arith.constant 0 : index
    %c0_4 = arith.constant 0 : index
    %13 = vector.load %arg10[%c0_3, %c0_4] : memref<64x128xf32, #tpu.memory_space<vmem>>, vector<64x128xf32>
    %c0_5 = arith.constant 0 : index
    %c0_6 = arith.constant 0 : index
    %14 = vector.load %arg4[%c0_5, %c0_6] : memref<128x128xbf16, #tpu.memory_space<vmem>>, vector<128x128xbf16>
    %cst = arith.constant dense<0.000000e+00> : vector<64x128xf32>
    %15 = tpu.matmul %12, %14, %cst {dimension_numbers = #tpu.dot_dimension_numbers<[1], [0], [0], [1], [0, 0, 1, 1], [], []>} : vector<64x128xbf16>, vector<128x128xbf16>, vector<64x128xf32> -> vector<64x128xf32>
    %16 = arith.addf %13, %15 : vector<64x128xf32>
    %c0_7 = arith.constant 0 : index
    %c0_8 = arith.constant 0 : index
    %17 = vector.load %arg10[%c0_7, %c0_8] : memref<64x128xf32, #tpu.memory_space<vmem>>, vector<64x128xf32>
    tpu.vector_store %arg10[%c0_7, %c0_8], %16 {strides = array<i32>} : memref<64x128xf32, #tpu.memory_space<vmem>>, vector<64x128xf32>,
    %c1_i32 = arith.constant 1 : i32
    %18 = arith.cmpi eq, %arg1, %c1_i32 : i32
    %19 = arith.extui %18 : i1 to i32
    %c0_i32_9 = arith.constant 0 : i32
    %20 = arith.cmpi ne, %19, %c0_i32_9 : i32
    scf.if %20 {
      %c0_10 = arith.constant 0 : index
      %c0_11 = arith.constant 0 : index
      %21 = vector.load %arg10[%c0_10, %c0_11] : memref<64x128xf32, #tpu.memory_space<vmem>>, vector<64x128xf32>
      %22 = arith.truncf %21 : vector<64x128xf32> to vector<64x128xbf16>
      %c0_12 = arith.constant 0 : index
      %c0_13 = arith.constant 0 : index
      %23 = vector.load %arg5[%c0_12, %c0_13] : memref<128x128xbf16, #tpu.memory_space<vmem>>, vector<128x128xbf16>
      %cst_14 = arith.constant dense<0.000000e+00> : vector<64x128xf32>
      %24 = tpu.matmul %22, %23, %cst_14 {dimension_numbers = #tpu.dot_dimension_numbers<[1], [0], [0], [1], [0, 0, 1, 1], [], []>} : vector<64x128xbf16>, vector<128x128xbf16>, vector<64x128xf32> -> vector<64x128xf32>
      %c0_15 = arith.constant 0 : index
      %c0_16 = arith.constant 0 : index
      %25 = vector.load %arg6[%c0_15, %c0_16] : memref<1x128xf32, #tpu.memory_space<vmem>>, vector<1x128xf32>
      %26 = vector.broadcast %25 : vector<1x128xf32> to vector<64x128xf32>
      %27 = arith.addf %24, %26 : vector<64x128xf32>
      %cst_17 = arith.constant 0.000000e+00 : f32
      %28 = vector.broadcast %cst_17 : f32 to vector<64x128xf32>
      %29 = arith.cmpf ogt, %27, %28 : vector<64x128xf32>
      %c0_18 = arith.constant 0 : index
      %30 = memref.load %arg2[%c0_18] : memref<2xf32, #tpu.memory_space<smem>>
      %31 = vector.broadcast %30 : f32 to vector<64x128xf32>
      %32 = arith.mulf %31, %27 : vector<64x128xf32>
      %33 = arith.select %29, %27, %32 : vector<64x128xi1>, vector<64x128xf32>
      %34 = arith.truncf %33 : vector<64x128xf32> to vector<64x128xbf16>
      %c0_19 = arith.constant 0 : index
      %c0_20 = arith.constant 0 : index
      %35 = vector.load %arg7[%c0_19, %c0_20] : memref<128x128xbf16, #tpu.memory_space<vmem>>, vector<128x128xbf16>
      %cst_21 = arith.constant dense<0.000000e+00> : vector<64x128xf32>
      %36 = tpu.matmul %34, %35, %cst_21 {dimension_numbers = #tpu.dot_dimension_numbers<[1], [0], [0], [1], [0, 0, 1, 1], [], []>} : vector<64x128xbf16>, vector<128x128xbf16>, vector<64x128xf32> -> vector<64x128xf32>
      %c0_22 = arith.constant 0 : index
      %c0_23 = arith.constant 0 : index
      %37 = vector.load %arg8[%c0_22, %c0_23] : memref<1x128xf32, #tpu.memory_space<vmem>>, vector<1x128xf32>
      %38 = vector.broadcast %37 : vector<1x128xf32> to vector<64x128xf32>
      %39 = arith.addf %36, %38 : vector<64x128xf32>
      %cst_24 = arith.constant 0.000000e+00 : f32
      %40 = vector.broadcast %cst_24 : f32 to vector<64x128xf32>
      %41 = arith.cmpf ogt, %39, %40 : vector<64x128xf32>
      %c1 = arith.constant 1 : index
      %42 = memref.load %arg2[%c1] : memref<2xf32, #tpu.memory_space<smem>>
      %43 = vector.broadcast %42 : f32 to vector<64x128xf32>
      %44 = arith.mulf %43, %39 : vector<64x128xf32>
      %45 = arith.select %41, %39, %44 : vector<64x128xi1>, vector<64x128xf32>
      %c0_25 = arith.constant 0 : index
      %c0_26 = arith.constant 0 : index
      %46 = vector.load %arg9[%c0_25, %c0_26] : memref<64x128xf32, #tpu.memory_space<vmem>>, vector<64x128xf32>
      tpu.vector_store %arg9[%c0_25, %c0_26], %45 {strides = array<i32>} : memref<64x128xf32, #tpu.memory_space<vmem>>, vector<64x128xf32>,
    } else {
    }
    return
  }
  func.func @transform_0(%arg0: i32, %arg1: i32) -> i32 {
    %c0_i32 = arith.constant 0 : i32
    %c0_i32_0 = arith.constant 0 : i32
    return %c0_i32 : i32
  }
  func.func @transform_1(%arg0: i32, %arg1: i32) -> (i32, i32) {
    %c0_i32 = arith.constant 0 : i32
    return %arg0, %arg1 : i32, i32
  }
  func.func @transform_2(%arg0: i32, %arg1: i32) -> (i32, i32) {
    %c0_i32 = arith.constant 0 : i32
    %c0_i32_0 = arith.constant 0 : i32
    return %arg1, %c0_i32 : i32, i32
  }
  func.func @transform_3(%arg0: i32, %arg1: i32) -> (i32, i32) {
    %c0_i32 = arith.constant 0 : i32
    %c0_i32_0 = arith.constant 0 : i32
    %c0_i32_1 = arith.constant 0 : i32
    return %c0_i32, %c0_i32_0 : i32, i32
  }
  func.func @transform_4(%arg0: i32, %arg1: i32) -> (i32, i32) {
    %c0_i32 = arith.constant 0 : i32
    %c0_i32_0 = arith.constant 0 : i32
    %c0_i32_1 = arith.constant 0 : i32
    return %c0_i32, %c0_i32_0 : i32, i32
  }
  func.func @transform_5(%arg0: i32, %arg1: i32) -> (i32, i32) {
    %c0_i32 = arith.constant 0 : i32
    %c0_i32_0 = arith.constant 0 : i32
    %c0_i32_1 = arith.constant 0 : i32
    return %c0_i32, %c0_i32_0 : i32, i32
  }
  func.func @transform_6(%arg0: i32, %arg1: i32) -> (i32, i32) {
    %c0_i32 = arith.constant 0 : i32
    %c0_i32_0 = arith.constant 0 : i32
    %c0_i32_1 = arith.constant 0 : i32
    return %c0_i32, %c0_i32_0 : i32, i32
  }
  func.func @transform_7(%arg0: i32, %arg1: i32) -> (i32, i32) {
    %c0_i32 = arith.constant 0 : i32
    %c0_i32_0 = arith.constant 0 : i32
    return %arg0, %c0_i32 : i32, i32
  }
}

module attributes {stable_mosaic.version = 11 : i64} {
  func.func @bigmodel_kernel(%arg0: i32, %arg1: i32, %arg2: memref<2xf32, #tpu.memory_space<smem>>, %arg3: memref<64x128xf32, #tpu.memory_space<vmem>>, %arg4: memref<128x128xbf16, #tpu.memory_space<vmem>>, %arg5: memref<128x128xbf16, #tpu.memory_space<vmem>>, %arg6: memref<1x128xf32, #tpu.memory_space<vmem>>, %arg7: memref<128x128xbf16, #tpu.memory_space<vmem>>, %arg8: memref<1x128xf32, #tpu.memory_space<vmem>>, %arg9: memref<64x128xf32, #tpu.memory_space<vmem>>, %arg10: memref<64x128xf32, #tpu.memory_space<vmem>>) attributes {dimension_semantics = [#tpu.dimension_semantics<parallel>, #tpu.dimension_semantics<arbitrary>], iteration_bounds = array<i64: 4, 2>, scalar_prefetch = 0 : i64, scratch_operands = 1 : i64, tpu.core_type = #tpu.core_type<tc>, window_params = [{transform_indices = @transform_0, window_bounds = array<i64: 2>}, {transform_indices = @transform_1, window_bounds = array<i64: 64, 128>}, {transform_indices = @transform_2, window_bounds = array<i64: 128, 128>}, {pipeline_mode = #tpu.pipeline_mode<synchronous>, transform_indices = @transform_3, window_bounds = array<i64: 128, 128>}, {pipeline_mode = #tpu.pipeline_mode<synchronous>, transform_indices = @transform_4, window_bounds = array<i64: 1, 128>}, {pipeline_mode = #tpu.pipeline_mode<synchronous>, transform_indices = @transform_5, window_bounds = array<i64: 128, 128>}, {pipeline_mode = #tpu.pipeline_mode<synchronous>, transform_indices = @transform_6, window_bounds = array<i64: 1, 128>}, {transform_indices = @transform_7, window_bounds = array<i64: 64, 128>}]} {
    %c0_i32 = arith.constant 0 : i32
    %0 = arith.cmpi eq, %arg1, %c0_i32 : i32
    %1 = arith.extui %0 : i1 to i32
    %c0_i32_0 = arith.constant 0 : i32
    %2 = arith.cmpi ne, %1, %c0_i32_0 : i32
    scf.if %2 {
      %cst_10 = arith.constant 0.000000e+00 : f32
      %21 = vector.broadcast %cst_10 : f32 to vector<64x128xf32>
      %c0_11 = arith.constant 0 : index
      %c0_12 = arith.constant 0 : index
      %22 = vector.load %arg10[%c0_11, %c0_12] : memref<64x128xf32, #tpu.memory_space<vmem>>, vector<64x128xf32>
      tpu.vector_store %arg10[%c0_11, %c0_12], %21 {strides = array<i32>} : memref<64x128xf32, #tpu.memory_space<vmem>>, vector<64x128xf32>,
    } else {
    }
    %c0 = arith.constant 0 : index
    %c0_1 = arith.constant 0 : index
    %3 = vector.load %arg3[%c0, %c0_1] : memref<64x128xf32, #tpu.memory_space<vmem>>, vector<64x128xf32>
    %4 = arith.truncf %3 : vector<64x128xf32> to vector<64x128xbf16>
    %5 = tpu.iota {dimensions = array<i32: 1>} : vector<64x128xi32>
    %c128_i32 = arith.constant 128 : i32
    %6 = arith.muli %arg1, %c128_i32 : i32
    %c200_i32 = arith.constant 200 : i32
    %7 = arith.subi %c200_i32, %6 : i32
    %8 = vector.broadcast %7 : i32 to vector<64x128xi32>
    %9 = arith.cmpi slt, %5, %8 : vector<64x128xi32>
    %c0_i32_2 = arith.constant 0 : i32
    %10 = arith.sitofp %c0_i32_2 : i32 to bf16
    %11 = vector.broadcast %10 : bf16 to vector<64x128xbf16>
    %12 = arith.select %9, %4, %11 : vector<64x128xi1>, vector<64x128xbf16>
    %c0_3 = arith.constant 0 : index
    %c0_4 = arith.constant 0 : index
    %13 = vector.load %arg10[%c0_3, %c0_4] : memref<64x128xf32, #tpu.memory_space<vmem>>, vector<64x128xf32>
    %c0_5 = arith.constant 0 : index
    %c0_6 = arith.constant 0 : index
    %14 = vector.load %arg4[%c0_5, %c0_6] : memref<128x128xbf16, #tpu.memory_space<vmem>>, vector<128x128xbf16>
    %cst = arith.constant dense<0.000000e+00> : vector<64x128xf32>
    %15 = tpu.matmul %12, %14, %cst {dimension_numbers = #tpu.dot_dimension_numbers<[1], [0], [0], [1], [0, 0, 1, 1], [], []>} : vector<64x128xbf16>, vector<128x128xbf16>, vector<64x128xf32> -> vector<64x128xf32>
    %16 = arith.addf %13, %15 : vector<64x128xf32>
    %c0_7 = arith.constant 0 : index
    %c0_8 = arith.constant 0 : index
    %17 = vector.load %arg10[%c0_7, %c0_8] : memref<64x128xf32, #tpu.memory_space<vmem>>, vector<64x128xf32>
    tpu.vector_store %arg10[%c0_7, %c0_8], %16 {strides = array<i32>} : memref<64x128xf32, #tpu.memory_space<vmem>>, vector<64x128xf32>,
    %c1_i32 = arith.constant 1 : i32
    %18 = arith.cmpi eq, %arg1, %c1_i32 : i32
    %19 = arith.extui %18 : i1 to i32
    %c0_i32_9 = arith.constant 0 : i32
    %20 = arith.cmpi ne, %19, %c0_i32_9 : i32
    scf.if %20 {
      %c0_10 = arith.constant 0 : index
      %c0_11 = arith.constant 0 : index
      %21 = vector.load %arg10[%c0_10, %c0_11] : memref<64x128xf32, #tpu.memory_space<vmem>>, vector<64x128xf32>
      %22 = arith.truncf %21 : vector<64x128xf32> to vector<64x128xbf16>
      %c0_12 = arith.constant 0 : index
      %c0_13 = arith.constant 0 : index
      %23 = vector.load %arg5[%c0_12, %c0_13] : memref<128x128xbf16, #tpu.memory_space<vmem>>, vector<128x128xbf16>
      %cst_14 = arith.constant dense<0.000000e+00> : vector<64x128xf32>
      %24 = tpu.matmul %22, %23, %cst_14 {dimension_numbers = #tpu.dot_dimension_numbers<[1], [0], [0], [1], [0, 0, 1, 1], [], []>} : vector<64x128xbf16>, vector<128x128xbf16>, vector<64x128xf32> -> vector<64x128xf32>
      %c0_15 = arith.constant 0 : index
      %c0_16 = arith.constant 0 : index
      %25 = vector.load %arg6[%c0_15, %c0_16] : memref<1x128xf32, #tpu.memory_space<vmem>>, vector<1x128xf32>
      %26 = vector.broadcast %25 : vector<1x128xf32> to vector<64x128xf32>
      %27 = arith.addf %24, %26 : vector<64x128xf32>
      %cst_17 = arith.constant 0.000000e+00 : f32
      %28 = vector.broadcast %cst_17 : f32 to vector<64x128xf32>
      %29 = arith.cmpf ogt, %27, %28 : vector<64x128xf32>
      %c0_18 = arith.constant 0 : index
      %30 = memref.load %arg2[%c0_18] : memref<2xf32, #tpu.memory_space<smem>>
      %31 = vector.broadcast %30 : f32 to vector<64x128xf32>
      %32 = arith.mulf %31, %27 : vector<64x128xf32>
      %33 = arith.select %29, %27, %32 : vector<64x128xi1>, vector<64x128xf32>
      %34 = arith.truncf %33 : vector<64x128xf32> to vector<64x128xbf16>
      %c0_19 = arith.constant 0 : index
      %c0_20 = arith.constant 0 : index
      %35 = vector.load %arg7[%c0_19, %c0_20] : memref<128x128xbf16, #tpu.memory_space<vmem>>, vector<128x128xbf16>
      %cst_21 = arith.constant dense<0.000000e+00> : vector<64x128xf32>
      %36 = tpu.matmul %34, %35, %cst_21 {dimension_numbers = #tpu.dot_dimension_numbers<[1], [0], [0], [1], [0, 0, 1, 1], [], []>} : vector<64x128xbf16>, vector<128x128xbf16>, vector<64x128xf32> -> vector<64x128xf32>
      %c0_22 = arith.constant 0 : index
      %c0_23 = arith.constant 0 : index
      %37 = vector.load %arg8[%c0_22, %c0_23] : memref<1x128xf32, #tpu.memory_space<vmem>>, vector<1x128xf32>
      %38 = vector.broadcast %37 : vector<1x128xf32> to vector<64x128xf32>
      %39 = arith.addf %36, %38 : vector<64x128xf32>
      %cst_24 = arith.constant 0.000000e+00 : f32
      %40 = vector.broadcast %cst_24 : f32 to vector<64x128xf32>
      %41 = arith.cmpf ogt, %39, %40 : vector<64x128xf32>
      %c1 = arith.constant 1 : index
      %42 = memref.load %arg2[%c1] : memref<2xf32, #tpu.memory_space<smem>>
      %43 = vector.broadcast %42 : f32 to vector<64x128xf32>
      %44 = arith.mulf %43, %39 : vector<64x128xf32>
      %45 = arith.select %41, %39, %44 : vector<64x128xi1>, vector<64x128xf32>
      %c0_25 = arith.constant 0 : index
      %c0_26 = arith.constant 0 : index
      %46 = vector.load %arg9[%c0_25, %c0_26] : memref<64x128xf32, #tpu.memory_space<vmem>>, vector<64x128xf32>
      tpu.vector_store %arg9[%c0_25, %c0_26], %45 {strides = array<i32>} : memref<64x128xf32, #tpu.memory_space<vmem>>, vector<64x128xf32>,
    } else {
    }
    return
  }
  func.func @transform_0(%arg0: i32, %arg1: i32) -> i32 {
    %c0_i32 = arith.constant 0 : i32
    %c0_i32_0 = arith.constant 0 : i32
    return %c0_i32 : i32
  }
  func.func @transform_1(%arg0: i32, %arg1: i32) -> (i32, i32) {
    %c0_i32 = arith.constant 0 : i32
    return %arg0, %arg1 : i32, i32
  }
  func.func @transform_2(%arg0: i32, %arg1: i32) -> (i32, i32) {
    %c0_i32 = arith.constant 0 : i32
    %c0_i32_0 = arith.constant 0 : i32
    return %arg1, %c0_i32 : i32, i32
  }
  func.func @transform_3(%arg0: i32, %arg1: i32) -> (i32, i32) {
    %c0_i32 = arith.constant 0 : i32
    %c0_i32_0 = arith.constant 0 : i32
    %c0_i32_1 = arith.constant 0 : i32
    return %c0_i32, %c0_i32_0 : i32, i32
  }
  func.func @transform_4(%arg0: i32, %arg1: i32) -> (i32, i32) {
    %c0_i32 = arith.constant 0 : i32
    %c0_i32_0 = arith.constant 0 : i32
    %c0_i32_1 = arith.constant 0 : i32
    return %c0_i32, %c0_i32_0 : i32, i32
  }
  func.func @transform_5(%arg0: i32, %arg1: i32) -> (i32, i32) {
    %c0_i32 = arith.constant 0 : i32
    %c0_i32_0 = arith.constant 0 : i32
    %c0_i32_1 = arith.constant 0 : i32
    return %c0_i32, %c0_i32_0 : i32, i32
  }
  func.func @transform_6(%arg0: i32, %arg1: i32) -> (i32, i32) {
    %c0_i32 = arith.constant 0 : i32
    %c0_i32_0 = arith.constant 0 : i32
    %c0_i32_1 = arith.constant 0 : i32
    return %c0_i32, %c0_i32_0 : i32, i32
  }
  func.func @transform_7(%arg0: i32, %arg1: i32) -> (i32, i32) {
    %c0_i32 = arith.constant 0 : i32
    %c0_i32_0 = arith.constant 0 : i32
    return %arg0, %c0_i32 : i32, i32
  }
}

</mosaic_0001>

<bundles_post_ra>
// kernel: tpu_custom_call.1
= control target key start
LH: loop header
LB: loop body
LE: loop exit
PB: predicated region body
PF: predicated region fallthrough
CT: control target
= control target key end

     0   :  { %s2326_s0 = inlined_call_operand.hbm [shape: f32[2], index: 0, kind: input, shape index: {}]   ;;  %s2327_s1 = inlined_call_operand.hbm [shape: f32[200,200], index: 1, kind: input, shape index: {}]   ;;  %s2328_s2 = inlined_call_operand.hbm [shape: bf16[256,128], index: 2, kind: input, shape index: {}]   ;;  %s2329_s3 = inlined_call_operand.hbm [shape: bf16[128,128], index: 3, kind: input, shape index: {}]   ;;  %s2330_s4 = inlined_call_operand.vmem [shape: f32[1,128], index: 4, kind: input, shape index: {}]   ;;  %s2331_s5 = inlined_call_operand.hbm [shape: bf16[128,128], index: 5, kind: input, shape index: {}]   ;;  %s2332_s6 = inlined_call_operand.vmem [shape: f32[1,128], index: 6, kind: input, shape index: {}]   ;;  %s2333_s7 = inlined_call_operand.hbm [shape: f32[200,128], index: 7, kind: output, shape index: {}]  }
   0x1   :  { %2352 = sst [smem:[#allocation34_spill]] %s2330_s4 }
   0x2   :  { %2353 = sst [smem:[#allocation35_spill]] %s2332_s6 }
   0x3   :  { %2354 = sst [smem:[#allocation36_spill]] %s2333_s7 }
   0x4   :  { %12 = vsyncpa [#allocation6], 0 }
   0x5   :  { %13 = vsyncpa [#allocation4], 0 }
   0x6   :  { %15 = vsyncpa [#allocation4 + $0x1], 0 }
   0x7   :  { %16 = vsyncpa [#allocation9], 0 }
   0x8   :  { %18 = vsyncpa [#allocation9 + $0x1], 0 }
   0x9   :  { %19 = vsyncpa [#allocation12], 0 }
   0xa   :  { %20 = vsyncpa [#allocation5], 0 }
   0xb   :  { %22 = vsyncpa [#allocation5 + $0x1], 0  ;;  %s1848_s24 = smov 0   ;;  %s1850_s25 = smov 0  }
   0xc   :  { %s1852_s26 = smov 0   ;;  %s1854_s27 = smov 0  }
   0xd   :  { %s1856_s28 = smov 0   ;;  %s1858_s29 = smov 0  }
   0xe   :  { %s1860_s30 = smov 0   ;;  %s1862_s8 = smov 0  }
   0xf   :  { %s1864_s9 = smov 0   ;;  %s1866_s10 = smov 0  }
  0x10   :  { %s1868_s11 = smov 0   ;;  %s1870_s12 = smov 0  }
  0x11   :  { %s1872_s13 = smov 0   ;;  %s1874_s14 = smov 0  }
  0x12 LB: > { %2355 = sst [smem:[#allocation20_spill]] %s1737_s24  ;;  %s1917_s15 = sadd.s32 4294967295, %s1789_s14   ;;  %s1789_s14 = sphi %s1874_s14, %s28_s14   ;;  %s1785_s13 = sphi %s1872_s13, %s2421_s13   ;;  %s1781_s12 = sphi %s1870_s12, %s2420_s12   ;;  %s1777_s11 = sphi %s1868_s11, %s2419_s11   ;;  %s1773_s10 = sphi %s1866_s10, %s2418_s10   ;;  %s1769_s9 = sphi %s1864_s9, %s2417_s9   ;;  %s1765_s8 = sphi %s1862_s8, %s2416_s8   ;;  %s1761_s30 = sphi %s1860_s30, %s2415_s30   ;;  %s1757_s29 = sphi %s1858_s29, %s2414_s29   ;;  %s1753_s28 = sphi %s1856_s28, %s2413_s28   ;;  %s1749_s27 = sphi %s1854_s27, %s2408_s27   ;;  %s1745_s26 = sphi %s1852_s26, %s2407_s26   ;;  %s1741_s25 = sphi %s1850_s25, %s2406_s25   ;;  %s1737_s24 = sphi %s1848_s24, %s2405_s24  }
  0x13   : > { %2356 = sst [smem:[#allocation21_spill]] %s1741_s25  ;;  %s37_s17 = sadd.s32 1, %s1781_s12 }
  0x14   : > { %2357 = sst [smem:[#allocation22_spill]] %s1745_s26  ;;  %s40_s18 = sadd.s32 1, %s1785_s13 }
  0x15   : > { %2358 = sst [smem:[#allocation23_spill]] %s1753_s28  ;;  %p38_p0 = scmp.ge.s32.totalorder %s37_s17, 2 }
  0x16   : > { %2359 = sst [smem:[#allocation24_spill]] %s1773_s10  ;;  %s70_s19 = sadd.s32 1, %s1769_s9 }
  0x17   : > { %2360 = sst [smem:[#allocation25_spill]] %s1777_s11  ;;  %p77_p1 = scmp.ne.s32.totalorder %s1769_s9, %s1765_s8 }
  0x18   : > { %p78_p2 = scmp.eq.s32.totalorder %s1789_s14, 0  ;;  %s2423_s17 = smov (%p38_p0, %s37_s17), 0 }
  0x19   : > { %2361 = sst [smem:[#allocation26_spill]] %s2423_s17  ;;  %s2425_s18 = smov (!%p38_p0, %s40_s18), %s1785_s13 }
  0x1a   : > { %s66_s20 = ssub.s32 %s1781_s12, %s2423_s17  ;;  %p1933_p3 = por %p78_p2, %p77_p1 }
  0x1b   : > { %p42_p4 = scmp.ge.s32.totalorder %s2425_s18, 4  ;;  %p83_p5 = scmp.ne.s32.totalorder %s1765_s8, %s1761_s30 }
  0x1c   : > { %p2337_p6 = scmp.eq.s32.totalorder %s1917_s15, 0  ;;  %p94_p7 = scmp.eq.s32.totalorder %s66_s20, 0 }
  0x1d   : > { %s2427_s18 = smov (%p42_p4, %s2425_s18), 0  ;;  %s96_s23 = sadd.s32 1, %s1757_s29 }
  0x1e   : > { %2363 = sst [smem:[#allocation27_spill]] %s2427_s18  ;;  %p1943_p8 = por %p2337_p6, %p83_p5 }
  0x1f   : > { %s65_s30 = ssub.s32 %s1785_s13, %s2427_s18  ;;  %p103_p9 = scmp.ne.s32.totalorder %s1757_s29, %s1753_s28 }
  0x20   : > { %s2364_s22 = scalar_select %p1943_p8, 1, 0 }
  0x21   : > { %s67_s16 = sor.u32 %s66_s20, %s65_s30  ;;  %p109_p10 = scmp.ne.s32.totalorder %s1753_s28, %s1749_s27 }
  0x22   : > { %p68_p11 = scmp.eq.s32.totalorder %s67_s16, 0  ;;  %p1956_p12 = por %p103_p9, %p78_p2 }
  0x23   : > { %s1961_s7 = scalar_select %p94_p7, %s1757_s29, %s96_s23  }
  0x24   : > { %s1964_s11 = scalar_select %p68_p11, %s1769_s9, %s70_s19  }
  0x25   : > { %2366 = sst [smem:[#allocation28_spill]] %s1961_s7  ;;  %p1968_p13 = por %p109_p10, %p2337_p6 }
  0x26   : > { %2367 = sst [smem:[#allocation29_spill]] %s1964_s11  ;;  %p204_p0 = scmp.eq.s32.totalorder %s65_s30, 0 }
  0x27   : > { %s2368_s6 = scalar_select %p1968_p13, 1, 0 }
  0x28   : > { %s206_s20 = sadd.s32 1, %s1745_s26  ;;  %p216_p1 = scmp.ne.s32.totalorder %s1745_s26, %s1741_s25 }
  0x29   : > { %2369 = sst [smem:[#allocation30_spill]] %s2368_s6  ;;  %p217_p4 = scmp.eq.s32.totalorder %s1917_s15, 7 }
  0x2a   : > { %s1976_s27 = scalar_select %p204_p0, %s1745_s26, %s206_s20  }
  0x2b   : > { %p222_p2 = scmp.ne.s32.totalorder %s1741_s25, %s1737_s24  ;;  %s2371_s16 = sadd.s32 4294967294, %s1789_s14  }
  0x2c   : > { %2370 = sst [smem:[#allocation31_spill]] %s1976_s27  ;;  %p223_p5 = scmp.eq.s32.totalorder %s2371_s16, 7 }
  0x2d   : > { %p1122_p9 = scmp.ge.s32.totalorder %s1789_s14, 1  ;;  %p1984_p7 = por %p217_p4, %p216_p1 }
  0x2e   : > { %p230_p11 = scmp.lt.s32.totalorder %s1789_s14, 9  ;;  %p1989_p10 = por %p223_p5, %p222_p2 }
  0x2f   : > { %s2372_s23 = scalar_select %p1984_p7, 1, 0 }
  0x30   : > { %s2374_s19 = scalar_select %p1989_p10, 1, 0 }
  0x31   : > { %2373 = sst [smem:[#allocation32_spill]] %s2372_s23  ;;  %p1993_p6 = pnand %p1122_p9, %p230_p11 }
  0x32   : > { %2375 = sst [smem:[#allocation33_spill]] %s2374_s19  ;;  %s1791_s20 = smov [#allocation10]  }
  0x33   : > { %s2376_s30 = scalar_select %p1993_p6, 1, 0 }
  0x34   : > { %p1331_p0 = pneg %p1993_p6  ;;  %s251_s18 = sshll.u32 %s1791_s20, 4  ;;  %s1999_s18 = int_to_ptr.vmem [resolvable:$true] %s251_s18 }
  0x35   : > { %p2377_p1 = scmp.eq.s32.totalorder %s1917_s15, 0  ;;  %s1792_s11 = smov [#allocation11]  }
  0x36   : > { %s267_s7 = sshll.u32 %s1792_s11, 4  ;;  %s1502_s19 = scalar_lea.hbm %s2326_s0, 16  ;;  %s2007_s7 = int_to_ptr.vmem [resolvable:$true] %s267_s7 }
  0x37   : > { %p2003_p4 = pnand %p1331_p0, %p2377_p1  ;;  %p1503_p2 = scmp.ne.s32.totalorder %s2326_s0, %s1502_s19 }
  0x38   : > { %p1509_p0 = scmp.lt.u32.totalorder %s1502_s19, %s2326_s0 }
  0x39   : > { %p2017_p5 = pneg %p2003_p4 }
  0x3b   : > { %p1505_p9 = pnand %p2017_p5, %p1503_p2 }
  0x3d   : > { %p1506_p11 = pneg %p1505_p9 }
  0x3f   : > { %p1511_p1 = pnand %p1509_p0, %p1506_p11 }
  0x41   : > { %1514 = shalt.err (!%p1511_p1)
}
  0x42   : > { %s1793_s26 = smov [#allocation3]   ;;  %s1515_s25 = scalar_lea.hbm %s2329_s3, 1024 }
  0x43   : > { %1334 = dma.hbm_to_smem (!%p2003_p4), %s2326_s0, 16, %s1793_s26, [#allocation6]  }
  0x44   : > { %p1516_p2 = scmp.ne.s32.totalorder %s2329_s3, %s1515_s25  ;;  %p1522_p0 = scmp.lt.u32.totalorder %s1515_s25, %s2329_s3 }
  0x46   : > { %p1518_p9 = pnand %p1516_p2, %p2017_p5 }
  0x48   : > { %p1519_p11 = pneg %p1518_p9 }
  0x4a   : > { %p1524_p1 = pnand %p1522_p0, %p1519_p11 }
  0x4c   : > { %1527 = shalt.err (!%p1524_p1)
}
  0x4d   : > { %s1528_s11 = scalar_lea.vmem %s1999_s18, 1024  ;;  %p1536_p8 = scmp.lt.s32.totalorder %s1999_s18, %s1999_s18 }
  0x4e   : > { %p1529_p10 = scmp.ne.s32.totalorder %s1999_s18, %s1528_s11  ;;  %p1537_p6 = scmp.lt.s32.totalorder %s1528_s11, %s1528_s11 }
  0x50   : > { %p1531_p7 = pnand %p1529_p10, %p2017_p5  ;;  %p1538_p2 = por %p1537_p6, %p1536_p8 }
  0x52   : > { %p1532_p13 = pneg %p1531_p7 }
  0x54   : > { %p1539_p9 = pnand %p1538_p2, %p1532_p13 }
  0x56   : > { %1542 = shalt.err (!%p1539_p9)
}
  0x57   : > { %s1794_s6 = smov 64   ;;  %s1795_s25 = smov 4  }
  0x58   : > { %1337 = dma.hbm_to_vmem [thread:$0]  (!%p2003_p4), %s2329_s3, 1024, %s1999_s18, [#allocation9], %s1794_s6, %s1794_s6, %s1795_s25  }
  0x59   : > { %s1543_s27 = scalar_lea.hbm %s2331_s5, 1024 }
  0x5a   : > { %p1544_p6 = scmp.ne.s32.totalorder %s2331_s5, %s1543_s27  ;;  %p1550_p7 = scmp.lt.u32.totalorder %s1543_s27, %s2331_s5 }
  0x5c   : > { %p1546_p8 = pnand %p1544_p6, %p2017_p5 }
  0x5e   : > { %p1547_p13 = pneg %p1546_p8 }
  0x60   : > { %p1552_p10 = pnand %p1550_p7, %p1547_p13 }
  0x62   : > { %1555 = shalt.err (!%p1552_p10)
}
  0x63   : > { %s1556_s18 = scalar_lea.vmem %s2007_s7, 1024  ;;  %p1564_p2 = scmp.lt.s32.totalorder %s2007_s7, %s2007_s7 }
  0x64   : > { %p1557_p11 = scmp.ne.s32.totalorder %s2007_s7, %s1556_s18  ;;  %p1565_p9 = scmp.lt.s32.totalorder %s1556_s18, %s1556_s18 }
  0x66   : > { %p1559_p0 = pnand %p1557_p11, %p2017_p5  ;;  %p1566_p6 = por %p1565_p9, %p1564_p2 }
  0x68   : > { %p1560_p1 = pneg %p1559_p0 }
  0x6a   : > { %p1567_p8 = pnand %p1566_p6, %p1560_p1 }
  0x6c   : > { %1570 = shalt.err (!%p1567_p8)
}
  0x6d   : > { %1340 = dma.hbm_to_vmem [thread:$0]  (!%p2003_p4), %s2331_s5, 1024, %s2007_s7, [#allocation12], %s1794_s6, %s1794_s6, %s1795_s25  }
  0x6e   : > { %p1126_p13 = scmp.ge.s32.totalorder %s1789_s14, 8 }
  0x70   : > { %280 = sbr.rel (%p1126_p13) target bundleno = 183 (0xb7), region = 36 }
  0x77   : > { %283 = sbr.rel (!%p1933_p3) target bundleno = 156 (0x9c), region = 40  ;;  %s284_s20 = sand.u32 (%p1933_p3), 1, %s1769_s9  }
  0x78   : > { %s1128_s26 = sshll.u32 (%p1933_p3), %s1785_s13, 3  ;;  %s1127_s24 = sshll.u32 (%p1933_p3), %s284_s20, 6 }
  0x79   : > { %s290_s27 = ssub.s32 (%p1933_p3), 25, %s1128_s26  ;;  %s2085_s4 = scalar_lea.sflag (%p1933_p3), [#allocation4], %s284_s20 }
  0x7a   : > { %p291_p5 = scmp.lt.s32.totalorder (%p1933_p3), %s290_s27, 8  ;;  %s288_s7 = scalar_lea.vmem (%p1933_p3), [#allocation7], %s1127_s24 }
  0x7e   : > { %s2429_s27 = smov (!%p291_p5, %s290_s27), 8 }
  0x7f   : > { %s2082_s16 = sshll.u32 %s2429_s27, 7 }
  0x80   : > { %s295_s23 = ssub.s32 1024, %s2082_s16 }
  0x81   : > { %296 = vsyncadd %s2085_s4, %s295_s23  ;;  %p1130_p3 = scmp.ne.s32.totalorder %s2082_s16, 0  ;;  %s1188_s21 = sshll.u32 %s1785_s13, 4 }
  0x82   : > { %s299_s6 = sadd.s32 %s1781_s12, %s1188_s21  ;;  %s303_s25 = sshll.u32 %s288_s7, 4  ;;  %s2091_s25 = int_to_ptr.vmem [resolvable:$true] %s303_s25 }
  0x83   : > { %s1132_s19 = sshll.u32 %s299_s6, 7  ;;  %s1575_s24 = scalar_lea.hbm %s2327_s1, 6400 }
  0x84   : > { %s2096_s28 = scalar_lea.hbm %s2327_s1, %s1132_s19 }
  0x85   : > { %s1571_s10 = scalar_lea.hbm %s2096_s28, %s2082_s16  ;;  %p1576_p11 = scmp.lt.u32.totalorder %s2096_s28, %s2327_s1 }
  0x86   : > { %p1572_p4 = scmp.ne.s32.totalorder %s2096_s28, %s1571_s10  ;;  %p1577_p0 = scmp.lt.u32.totalorder %s1575_s24, %s1571_s10 }
  0x87   : > { %p1579_p2 = scmp.lt.u32.totalorder %s1571_s10, %s2096_s28 }
  0x88   : > { %p1573_p7 = pnand %p1572_p4, %p1130_p3  ;;  %p1578_p1 = por %p1577_p0, %p1576_p11 }
  0x8a   : > { %p1574_p10 = pneg %p1573_p7  ;;  %p1580_p9 = por %p1579_p2, %p1578_p1 }
  0x8c   : > { %p1581_p6 = pnand %p1580_p9, %p1574_p10 }
  0x8e   : > { %1584 = shalt.err (!%p1581_p6)
}
  0x8f   : > { %s1585_s7 = scalar_lea.vmem %s2091_s25, %s2082_s16  ;;  %s1796_s21 = smov [#allocation7]  }
  0x90   : > { %p1586_p8 = scmp.ne.s32.totalorder %s2091_s25, %s1585_s7  ;;  %s1589_s6 = sshll.u32 %s1796_s21, 4  ;;  %s1590_s6 = int_to_ptr.vmem [resolvable:$false] %s1589_s6 }
  0x91   : > { %s1591_s19 = scalar_lea.vmem %s1590_s6, 2048  ;;  %p1592_p4 = scmp.lt.s32.totalorder %s2091_s25, %s1590_s6 }
  0x92   : > { %p1587_p13 = pnand %p1586_p8, %p1130_p3  ;;  %p1593_p7 = scmp.lt.s32.totalorder %s1591_s19, %s1585_s7 }
  0x94   : > { %p1588_p5 = pneg %p1587_p13  ;;  %p1594_p11 = por %p1593_p7, %p1592_p4 }
  0x96   : > { %p1595_p0 = pnand %p1594_p11, %p1588_p5 }
  0x98   : > { %1598 = shalt.err (!%p1595_p0)
}
  0x99   : > { %s1797_s11 = smov 256   ;;  %s1798_s18 = smov 128  }
  0x9a   : > { %s1799_s10 = smov 8  }
  0x9b   : > { %309 = dma.hbm_to_vmem [thread:$0]  (%p1130_p3), %s2096_s28, %s2082_s16, %s2091_s25, %s2085_s4, %s1797_s11, %s1798_s18, %s1799_s10  }
  0x9c PF: > { %s313_s20 = sand.u32 1, %s1789_s14   ;;  %s315_s26 = sand.u32 1, %s1757_s29  }
  0x9d   : > { %s1135_s24 = sshll.u32 %s315_s26, 6  ;;  %s1189_s27 = sshll.u32 %s1781_s12, 10 }
  0x9e   : > { %s2129_s21 = scalar_lea.hbm %s2328_s2, %s1189_s27  ;;  %s317_s6 = scalar_lea.vmem [#allocation8], %s1135_s24 }
  0x9f   : > { %s324_s16 = sshll.u32 %s317_s6, 4  ;;  %s2133_s4 = scalar_lea.sflag [#allocation9], %s313_s20  ;;  %s2131_s16 = int_to_ptr.vmem [resolvable:$true] %s324_s16 }
  0xa0   : > { %s1599_s25 = scalar_lea.hbm %s2129_s21, 1024  ;;  %s1603_s11 = scalar_lea.hbm %s2328_s2, 2048 }
  0xa1   : > { %p1600_p3 = scmp.ne.s32.totalorder %s2129_s21, %s1599_s25  ;;  %p1604_p2 = scmp.lt.u32.totalorder %s2129_s21, %s2328_s2 }
  0xa2   : > { %p1605_p9 = scmp.lt.u32.totalorder %s1603_s11, %s1599_s25  ;;  %p1607_p8 = scmp.lt.u32.totalorder %s1599_s25, %s2129_s21 }
  0xa3   : > { %p1601_p10 = pnand %p1600_p3, %p1956_p12 }
  0xa4   : > { %p1606_p6 = por %p1605_p9, %p1604_p2 }
  0xa5   : > { %p1602_p1 = pneg %p1601_p10 }
  0xa6   : > { %p1608_p13 = por %p1607_p8, %p1606_p6 }
  0xa8   : > { %p1609_p5 = pnand %p1608_p13, %p1602_p1 }
  0xaa   : > { %1612 = shalt.err (!%p1609_p5)
}
  0xab   : > { %s1613_s20 = scalar_lea.vmem %s2131_s16, 1024  ;;  %s1800_s26 = smov [#allocation8]  }
  0xac   : > { %p1614_p4 = scmp.ne.s32.totalorder %s2131_s16, %s1613_s20  ;;  %s1617_s24 = sshll.u32 %s1800_s26, 4  ;;  %s1618_s24 = int_to_ptr.vmem [resolvable:$false] %s1617_s24 }
  0xad   : > { %s1619_s27 = scalar_lea.vmem %s1618_s24, 2048  ;;  %p1620_p0 = scmp.lt.s32.totalorder %s2131_s16, %s1618_s24 }
  0xae   : > { %p1615_p7 = pnand %p1614_p4, %p1956_p12  ;;  %p1621_p3 = scmp.lt.s32.totalorder %s1619_s27, %s1613_s20 }
  0xb0   : > { %p1616_p11 = pneg %p1615_p7  ;;  %p1622_p10 = por %p1621_p3, %p1620_p0 }
  0xb2   : > { %p1623_p2 = pnand %p1622_p10, %p1616_p11 }
  0xb4   : > { %1626 = shalt.err (!%p1623_p2)
}
  0xb5   : > { %s1801_s23 = smov 64   ;;  %s1802_s7 = smov 4  }
  0xb6   : > { %1321 = dma.hbm_to_vmem [thread:$0]  (%p1956_p12), %s2129_s21, 1024, %s2131_s16, %s2133_s4, %s1801_s23, %s1801_s23, %s1802_s7  }
  0xb7 PF: > { %p2380_p1 = scmp.ne.s32.totalorder %s2376_s30, 0 }
  0xb8   : > { %p2381_p9 = scmp.eq.s32.totalorder (!%p2380_p1), %s1917_s15, 0 }
  0xb9   : > { %336 = sbr.rel (%p2380_p1) target bundleno = 990 (0x3de), region = 48 }
  0xc0   : > { %1712 = dma.done.wait (%p2381_p9), [#allocation6], 16   ;;  %p2382_p6 = pmov %p2381_p9 }
  0xc1   : > { %s342_s6 = sand.u32 1, %s1765_s8   ;;  %p2383_p8 = scmp.ne.s32.totalorder %s2364_s22, 0 }
  0xc2   : > { %1714 = vsyncadd (%p2382_p6), [#allocation6], 4294967280  ;;  %s1140_s25 = sshll.u32 %s342_s6, 6  ;;  %s343_s28 = scalar_lea.sflag [#allocation4], %s342_s6 }
  0xc3   : > { %s2164_s19 = scalar_lea.vmem [#allocation7], %s1140_s25 }
  0xc4   : > { %1716 = dma.done.wait (%p2383_p8), %s343_s28, 1024  }
  0xc5   : > { %1718 = vsyncadd (%p2383_p8), %s343_s28, 4294966272  ;;  %s2384_s17 = sld [smem:[#allocation23_spill]]  ;;  %s2385_s30 = sld [smem:[#allocation30_spill]] }
  0xc6   : > { %s351_s21 = sand.u32 1, %s1917_s15  }
  0xc7   : > { %s352_s11 = scalar_lea.sflag [#allocation9], %s351_s21 }
  0xcb   : > { %s353_s16 = sand.u32 1, %s2384_s17   ;;  %p2386_p12 = scmp.ne.s32.totalorder %s2385_s30, 0 }
  0xcc   : > { %s1141_s4 = sshll.u32 %s353_s16, 6 }
  0xcd   : > { %s2172_s18 = scalar_lea.vmem [#allocation8], %s1141_s4 }
  0xce   : > { %1720 = dma.done.wait (%p2386_p12), %s352_s11, 1024  }
  0xcf   : > { %1722 = vsyncadd (%p2386_p12), %s352_s11, 4294966272  ;;  %p2387_p13 = pmov %p2382_p6 }
  0xd0   : > { %p2388_p5 = pmov %p2382_p6 }
  0xd1   : > { %1724 = dma.done.wait (%p2387_p13), [#allocation9], 1024  }
  0xd2   : > { %1726 = vsyncadd (%p2388_p5), [#allocation9], 4294966272  ;;  %p2389_p4 = pmov %p2388_p5 }
  0xd4   : > { %1728 = dma.done.wait (%p2389_p4), [#allocation12], 1024   ;;  %p2390_p7 = pmov %p2389_p4 }
  0xd6   : > { %1730 = vsyncadd (%p2390_p7), [#allocation12], 4294966272 }
  0xd7   : > { %368 = sfence }
  0xd8   : > { %s2391_s22 = sld [smem:[#allocation21_spill]]  ;;  %s2392_s24 = sld [smem:[#allocation24_spill]] }
  0xde   : > { %s397_s10 = sand.u32 1, %s2391_s22   ;;  %p1145_p11 = scmp.ne.s32.totalorder %s2392_s24, 0 }
  0xdf   : > { %s1144_s20 = sshll.u32 %s397_s10, 6  ;;  %v1803_v0 = vmov (!%p1145_p11), 0.0  }
  0xe0   : > { %s2189_s26 = scalar_lea.vmem [#allocation13], %s1144_s20  ;;  %417 = sbr.rel (%p1145_p11) target bundleno = 231 (0xe7), region = 72  ;;  %418 = vst [vmem:[#allocation2] sm:$0xff] (!%p1145_p11), %v1803_v0  ;;  %419 = vst [vmem:[#allocation2 + $0x8] sm:$0xff] (!%p1145_p11), %v1803_v0 }
  0xe1   : > { %420 = vst [vmem:[#allocation2 + $0x10] sm:$0xff] (!%p1145_p11), %v1803_v0  ;;  %421 = vst [vmem:[#allocation2 + $0x18] sm:$0xff] (!%p1145_p11), %v1803_v0 }
  0xe2   : > { %422 = vst [vmem:[#allocation2 + $0x20] sm:$0xff] (!%p1145_p11), %v1803_v0  ;;  %423 = vst [vmem:[#allocation2 + $0x28] sm:$0xff] (!%p1145_p11), %v1803_v0 }
  0xe3   : > { %424 = vst [vmem:[#allocation2 + $0x30] sm:$0xff] (!%p1145_p11), %v1803_v0  ;;  %425 = vst [vmem:[#allocation2 + $0x38] sm:$0xff] (!%p1145_p11), %v1803_v0 }
  0xe7 PF: > { %s2393_s15 = sld [smem:[#allocation24_spill]]  ;;  %v1478_v1 = vld [vmem:[%s2172_s18] sm:$0xff]   ;;  %v438_v2 = vlaneseq  ;;  %v1479_v3 = vld [vmem:[%s2172_s18 + $0x8] sm:$0xff]   ;;  %v1480_v6 = vld [vmem:[%s2172_s18 + $0x10] sm:$0xff]   ;;  %v1804_v13 = vmov 0  }
  0xe8   : > { %1227 = vmatprep.subr.bf16.mxu0 %v1478_v1  ;;  %1299 = vmatprep.subr.bf16.mxu1 %v1478_v1  ;;  %v1481_v9 = vld [vmem:[%s2172_s18 + $0x18] sm:$0xff]   ;;  %v426_v10 = vld [vmem:[%s2164_s19] sm:$0xff]  ;;  %v427_v11 = vld [vmem:[%s2164_s19 + $0x8] sm:$0xff] }
  0xe9   : > { %v439_v4 = vand.u32 127, %v438_v2  ;;  %1228 = vmatpush3.bf16.msra.mxu0 %v1478_v1  ;;  %1307 = vmatpush3.bf16.msra.mxu1 %v1478_v1  ;;  %v447_v7 = vshrl.u32 %v438_v2, 7  ;;  %v434_v12 = vpack.c.bf16 %v427_v11, %v426_v10  ;;  %v430_v15 = vld [vmem:[%s2164_s19 + $0x20] sm:$0xff]  ;;  %v431_v16 = vld [vmem:[%s2164_s19 + $0x28] sm:$0xff]  ;;  %v1484_v21 = vld [vmem:[%s2172_s18 + $0x30] sm:$0xff]  }
  0xea   : > { %1229 = vmatprep.subr.bf16.mxu0 %v1479_v3  ;;  %1300 = vmatprep.subr.bf16.mxu1 %v1479_v3  ;;  %v436_v18 = vpack.c.bf16 %v431_v16, %v430_v15  ;;  %v1482_v19 = vld [vmem:[%s2172_s18 + $0x20] sm:$0xff]   ;;  %v1483_v20 = vld [vmem:[%s2172_s18 + $0x28] sm:$0xff]   ;;  %v1485_v22 = vld [vmem:[%s2172_s18 + $0x38] sm:$0xff]  }
  0xeb   : > { %v448_v8 = vsub.s32 0, %v447_v7  ;;  %v428_v23 = vld [vmem:[%s2164_s19 + $0x10] sm:$0xff]  ;;  %v429_v24 = vld [vmem:[%s2164_s19 + $0x18] sm:$0xff]  ;;  %v455_v31 = vld [vmem:[#allocation2] sm:$0xff] }
  0xec   : > { %v432_v25 = vld [vmem:[%s2164_s19 + $0x30] sm:$0xff]  ;;  %v433_v26 = vld [vmem:[%s2164_s19 + $0x38] sm:$0xff]  ;;  %v435_v27 = vpack.c.bf16 %v429_v24, %v428_v23  ;;  %v459_v32 = vld [vmem:[#allocation2 + $0x20] sm:$0xff] }
  0xed   : > { %s1146_s27 = sshll.u32 %s2393_s15, 7  ;;  %1230 = vmatpush3.bf16.msra.mxu0 %v1479_v3  ;;  %1308 = vmatpush3.bf16.msra.mxu1 %v1479_v3  ;;  %v437_v28 = vpack.c.bf16 %v433_v26, %v432_v25  ;;  %v457_v29 = vld [vmem:[#allocation2 + $0x10] sm:$0xff]  ;;  %v458_v35 = vld [vmem:[#allocation2 + $0x18] sm:$0xff]  ;;  %v456_v41 = vld [vmem:[#allocation2 + $0x8] sm:$0xff]  ;;  %p1159_p0 = scmp.ne.s32.totalorder %s2393_s15, 1 }
  0xee   : > { %s441_s23 = ssub.s32 200, %s1146_s27  ;;  %1231 = vmatprep.subr.bf16.mxu0 %v1480_v6  ;;  %1301 = vmatprep.subr.bf16.mxu1 %v1480_v6  ;;  %v461_v30 = vld [vmem:[#allocation2 + $0x30] sm:$0xff]  ;;  %v462_v36 = vld [vmem:[#allocation2 + $0x38] sm:$0xff]  ;;  %v460_v42 = vld [vmem:[#allocation2 + $0x28] sm:$0xff]  ;;  %s768_s7 = sld [smem:[#allocation3]] (!%p1159_p0) }
  0xef   : > { %v442_v5 = vstv %s441_s23  ;;  %v1486_v53 = vld [vmem:[#allocation10] sm:$0xff] (!%p1159_p0)   ;;  %v1487_v54 = vld [vmem:[#allocation10 + $0x8] sm:$0xff] (!%p1159_p0)   ;;  %v1488_v55 = vld [vmem:[#allocation10 + $0x10] sm:$0xff] (!%p1159_p0)   ;;  %s2394_s28 = sld [smem:[#allocation34_spill]] (!%p1159_p0)  ;;  %s1178_s19 = sld [smem:[#allocation3 + $0x1]] (!%p1159_p0) }
  0xf0   : > { %vm443_vm0 = vcmp.lt.s32.totalorder %v439_v4, %v442_v5  ;;  %v1489_v56 = vld [vmem:[#allocation10 + $0x18] sm:$0xff] (!%p1159_p0)   ;;  %v1490_v60 = vld [vmem:[#allocation10 + $0x20] sm:$0xff] (!%p1159_p0)   ;;  %v1495_v62 = vld [vmem:[#allocation11 + $0x8] sm:$0xff] (!%p1159_p0)   ;;  %s2395_s21 = sld [smem:[#allocation35_spill]] (!%p1159_p0) }
  0xf1   : > { %vm444_vm1 = vmpackc.low %vm443_vm0, %vm443_vm0  ;;  %1232 = vmatpush3.bf16.msra.mxu0 %v1480_v6  ;;  %1309 = vmatpush3.bf16.msra.mxu1 %v1480_v6  ;;  %v1494_v61 = vld [vmem:[#allocation11] sm:$0xff] (!%p1159_p0)   ;;  %v1491_v63 = vld [vmem:[#allocation10 + $0x28] sm:$0xff] (!%p1159_p0)  }
  0xf2   : > { %v445_v14 = vsel %vm444_vm1, 65537, %v1804_v13  ;;  %1233 = vmatprep.subr.bf16.mxu0 %v1481_v9  ;;  %1302 = vmatprep.subr.bf16.mxu1 %v1481_v9  ;;  %v1496_v0 = vld [vmem:[#allocation11 + $0x10] sm:$0xff] (!%p1159_p0)   ;;  %v1497_v1 = vld [vmem:[#allocation11 + $0x18] sm:$0xff] (!%p1159_p0)   ;;  %v1498_v3 = vld [vmem:[#allocation11 + $0x20] sm:$0xff] (!%p1159_p0)  }
  0xf3   : > { %v449_v17 = vrot.slane %v445_v14, %v448_v8  ;;  %v1492_v2 = vld [vmem:[#allocation10 + $0x30] sm:$0xff] (!%p1159_p0)   ;;  %v1493_v4 = vld [vmem:[#allocation10 + $0x38] sm:$0xff] (!%p1159_p0)   ;;  %v1499_v14 = vld [vmem:[#allocation11 + $0x28] sm:$0xff] (!%p1159_p0)  }
  0xf4   : > { %v1500_v15 = vld [vmem:[#allocation11 + $0x30] sm:$0xff] (!%p1159_p0)   ;;  %v1501_v16 = vld [vmem:[#allocation11 + $0x38] sm:$0xff] (!%p1159_p0)  }
  0xf5   : > { %vm450_vm2 = vcmp.ne.s16.totalorder %v449_v17, 0  ;;  %1234 = vmatpush3.bf16.msra.mxu0 %v1481_v9  ;;  %1310 = vmatpush3.bf16.msra.mxu1 %v1481_v9  ;;  %v1160_v17 = vld [vmem:[%s2394_s28] ss:$0 sm:$0xff] (!%p1159_p0) }
  0xf6   : > { %1243 = vmatprep.mubr.msk.bf16.mxu0 %vm450_vm2, %v434_v12  ;;  %1247 = vmatprep.mubr.msk.bf16.mxu1 %vm450_vm2, %v436_v18 }
  0xf7   : > { %1235 = vmatprep.subr.bf16.mxu0 %v1482_v19  ;;  %1303 = vmatprep.subr.bf16.mxu1 %v1482_v19 }
  0xf9   : > { %1236 = vmatpush3.bf16.msra.mxu0 %v1482_v19  ;;  %1311 = vmatpush3.bf16.msra.mxu1 %v1482_v19  ;;  %v769_v19 = vstv (!%p1159_p0), %s768_s7 }
  0xfa   : > { %1237 = vmatprep.subr.bf16.mxu0 %v1483_v20  ;;  %1304 = vmatprep.subr.bf16.mxu1 %v1483_v20 }
  0xfd   : > { %1238 = vmatpush3.bf16.msra.mxu0 %v1483_v20  ;;  %1312 = vmatpush3.bf16.msra.mxu1 %v1483_v20 }
  0xfe   : > { %1239 = vmatprep.subr.bf16.mxu0 %v1484_v21  ;;  %1305 = vmatprep.subr.bf16.mxu1 %v1484_v21 }
 0x101   : > { %1240 = vmatpush3.bf16.msra.mxu0 %v1484_v21  ;;  %1313 = vmatpush3.bf16.msra.mxu1 %v1484_v21 }
 0x102   : > { %1241 = vmatprep.subr.bf16.mxu0 %v1485_v22  ;;  %1306 = vmatprep.subr.bf16.mxu1 %v1485_v22 }
 0x105   : > { %1242 = vmatpush3.bf16.msra.mxu0 %v1485_v22  ;;  %1314 = vmatpush3.bf16.msra.mxu1 %v1485_v22 }
 0x106   : > { %1251 = vmatprep.subr.bf16.mxu0 (!%p1159_p0), %v1486_v53  ;;  %1275 = vmatprep.subr.bf16.mxu1 (!%p1159_p0), %v1494_v61 }
 0x108   : > { %1244 = vmatmul.mubr.msk.bf16.vlgmr.msra.gmra.mrb[0].mxu0 %vm450_vm2, %v435_v27  ;;  %1248 = vmatmul.mubr.msk.bf16.vlgmr.msra.gmra.mrb[0].mxu1 %vm450_vm2, %v437_v28 }
 0x109   : > { %1252 = vmatpush3.bf16.msra.mxu0 (!%p1159_p0), %v1486_v53  ;;  %1276 = vmatpush3.bf16.msra.mxu1 (!%p1159_p0), %v1494_v61 }
 0x10a   : > { %1253 = vmatprep.subr.bf16.mxu0 (!%p1159_p0), %v1487_v54  ;;  %1277 = vmatprep.subr.bf16.mxu1 (!%p1159_p0), %v1495_v62 }
 0x10d   : > { %1254 = vmatpush3.bf16.msra.mxu0 (!%p1159_p0), %v1487_v54  ;;  %1278 = vmatpush3.bf16.msra.mxu1 (!%p1159_p0), %v1495_v62 }
 0x10e   : > { %1255 = vmatprep.subr.bf16.mxu0 (!%p1159_p0), %v1488_v55  ;;  %1279 = vmatprep.subr.bf16.mxu1 (!%p1159_p0), %v1496_v0 }
 0x111   : > { %1256 = vmatpush3.bf16.msra.mxu0 (!%p1159_p0), %v1488_v55  ;;  %1280 = vmatpush3.bf16.msra.mxu1 (!%p1159_p0), %v1496_v0  ;;  %v1169_v55 = vld [vmem:[%s2395_s21] ss:$0 sm:$0xff] (!%p1159_p0) }
 0x112   : > { %1257 = vmatprep.subr.bf16.mxu0 (!%p1159_p0), %v1489_v56  ;;  %1281 = vmatprep.subr.bf16.mxu1 (!%p1159_p0), %v1497_v1 }
 0x115   : > { %1258 = vmatpush3.bf16.msra.mxu0 (!%p1159_p0), %v1489_v56  ;;  %1282 = vmatpush3.bf16.msra.mxu1 (!%p1159_p0), %v1497_v1 }
 0x116   : > { %1259 = vmatprep.subr.bf16.mxu0 (!%p1159_p0), %v1490_v60  ;;  %1283 = vmatprep.subr.bf16.mxu1 (!%p1159_p0), %v1498_v3 }
 0x119   : > { %1260 = vmatpush3.bf16.msra.mxu0 (!%p1159_p0), %v1490_v60  ;;  %1284 = vmatpush3.bf16.msra.mxu1 (!%p1159_p0), %v1498_v3 }
 0x11a   : > { %1261 = vmatprep.subr.bf16.mxu0 (!%p1159_p0), %v1491_v63  ;;  %1285 = vmatprep.subr.bf16.mxu1 (!%p1159_p0), %v1499_v14 }
 0x11d   : > { %1262 = vmatpush3.bf16.msra.mxu0 (!%p1159_p0), %v1491_v63  ;;  %1286 = vmatpush3.bf16.msra.mxu1 (!%p1159_p0), %v1499_v14 }
 0x11e   : > { %1263 = vmatprep.subr.bf16.mxu0 (!%p1159_p0), %v1492_v2  ;;  %1287 = vmatprep.subr.bf16.mxu1 (!%p1159_p0), %v1500_v15 }
 0x121   : > { %1264 = vmatpush3.bf16.msra.mxu0 (!%p1159_p0), %v1492_v2  ;;  %1288 = vmatpush3.bf16.msra.mxu1 (!%p1159_p0), %v1500_v15 }
 0x122   : > { %1265 = vmatprep.subr.bf16.mxu0 (!%p1159_p0), %v1493_v4  ;;  %1289 = vmatprep.subr.bf16.mxu1 (!%p1159_p0), %v1501_v16 }
 0x125   : > { %1266 = vmatpush3.bf16.msra.mxu0 (!%p1159_p0), %v1493_v4  ;;  %1290 = vmatpush3.bf16.msra.mxu1 (!%p1159_p0), %v1501_v16 }
 0x1db   : > { %v1245_v33 = vpop.f32.mrb[0].mxu0  ;;  %v1249_v34 = vpop.f32.mrb[0].mxu1  ;;  %611 = sbr.rel (%p1159_p0) target bundleno = 944 (0x3b0), region = 76 }
 0x1dc   : > { %v594_v37 = vadd.f32 %v1245_v33, %v457_v29  ;;  %v598_v38 = vadd.f32 %v1249_v34, %v461_v30  ;;  %v561_v39 = vpop.f32.mrb[1].mxu0  ;;  %v577_v40 = vpop.f32.mrb[1].mxu1 }
 0x1dd   : > { %v592_v43 = vadd.f32 %v561_v39, %v455_v31  ;;  %v596_v44 = vadd.f32 %v577_v40, %v459_v32  ;;  %v1246_v45 = vpop.f32.mrb[2].mxu0  ;;  %v1250_v46 = vpop.f32.mrb[2].mxu1 }
 0x1de   : > { %602 = vst [vmem:[#allocation2 + $0x10] sm:$0xff] %v594_v37  ;;  %606 = vst [vmem:[#allocation2 + $0x30] sm:$0xff] %v598_v38  ;;  %v595_v47 = vadd.f32 %v1246_v45, %v458_v35  ;;  %v599_v48 = vadd.f32 %v1250_v46, %v462_v36  ;;  %v564_v49 = vpop.f32.mrb[3].mxu0  ;;  %v580_v50 = vpop.f32.mrb[3].mxu1 }
 0x1df   : > { %600 = vst [vmem:[#allocation2] sm:$0xff] %v592_v43  ;;  %604 = vst [vmem:[#allocation2 + $0x20] sm:$0xff] %v596_v44  ;;  %v593_v51 = vadd.f32 %v564_v49, %v456_v41  ;;  %v597_v52 = vadd.f32 %v580_v50, %v460_v42 }
 0x1e0   : > { %603 = vst [vmem:[#allocation2 + $0x18] sm:$0xff] %v595_v47  ;;  %607 = vst [vmem:[#allocation2 + $0x38] sm:$0xff] %v599_v48 }
 0x1e1   : > { %601 = vst [vmem:[#allocation2 + $0x8] sm:$0xff] %v593_v51  ;;  %605 = vst [vmem:[#allocation2 + $0x28] sm:$0xff] %v597_v52 }
 0x1e5   : > { %v614_v5 = vld [vmem:[#allocation2 + $0x10] sm:$0xff] }
 0x1e6   : > { %v612_v57 = vld [vmem:[#allocation2] sm:$0xff]  ;;  %v618_v11 = vld [vmem:[#allocation2 + $0x30] sm:$0xff] }
 0x1e7   : > { %v615_v6 = vld [vmem:[#allocation2 + $0x18] sm:$0xff]  ;;  %v616_v7 = vld [vmem:[#allocation2 + $0x20] sm:$0xff] }
 0x1e8   : > { %v613_v58 = vld [vmem:[#allocation2 + $0x8] sm:$0xff]  ;;  %v621_v9 = vpack.c.bf16 %v615_v6, %v614_v5  ;;  %v619_v12 = vld [vmem:[#allocation2 + $0x38] sm:$0xff] }
 0x1e9   : > { %v620_v59 = vpack.c.bf16 %v613_v58, %v612_v57  ;;  %v617_v8 = vld [vmem:[#allocation2 + $0x28] sm:$0xff]  ;;  %v623_v13 = vpack.c.bf16 %v619_v12, %v618_v11  ;;  %v935_v57 = vstv %s1178_s19 }
 0x1ea   : > { %v622_v10 = vpack.c.bf16 %v617_v8, %v616_v7 }
 0x1eb   : > { %1267 = vmatprep.mubr.bf16.mxu0 %v620_v59 }
 0x1ec   : > { %1268 = vmatmul.mubr.bf16.vlgmr.msra.gmra.mrb[0].mxu0 %v621_v9 }
 0x1ed   : > { %1271 = vmatprep.mubr.bf16.mxu0 %v622_v10 }
 0x1f4   : > { %1272 = vmatmul.mubr.bf16.gmra.mrb[4].mxu0 %v623_v13 }
 0x2bf   : > { %v1269_v18 = vpop.f32.mrb[0].mxu0 }
 0x2c0   : > { %v738_v20 = vadd.f32 %v1269_v18, %v1160_v17  ;;  %v729_v21 = vpop.f32.mrb[1].mxu0 }
 0x2c1   : > { %v730_v22 = vadd.f32 %v1160_v17, %v729_v21  ;;  %v1270_v23 = vpop.f32.mrb[2].mxu0 }
 0x2c2   : > { %v772_v24 = vmul.f32 %v769_v19, %v738_v20  ;;  %v741_v25 = vadd.f32 %v1270_v23, %v1160_v17  ;;  %v732_v26 = vpop.f32.mrb[3].mxu0  ;;  %vm762_vm3 = vcmp.gt.f32.partialorder %v738_v20, 0.0 }
 0x2c3   : > { %v770_v27 = vmul.f32 %v769_v19, %v730_v22  ;;  %v733_v28 = vadd.f32 %v1160_v17, %v732_v26  ;;  %vm760_vm5 = vcmp.gt.f32.partialorder %v730_v22, 0.0 }
 0x2c4   : > { %vm763_vm4 = vcmp.gt.f32.partialorder %v741_v25, 0.0  ;;  %v773_v29 = vmul.f32 %v769_v19, %v741_v25  ;;  %v780_v31 = vsel %vm762_vm3, %v738_v20, %v772_v24 }
 0x2c5   : > { %v771_v30 = vmul.f32 %v769_v19, %v733_v28  ;;  %vm761_vm6 = vcmp.gt.f32.partialorder %v733_v28, 0.0  ;;  %v778_v34 = vsel %vm760_vm5, %v730_v22, %v770_v27 }
 0x2c6   : > { %v781_v32 = vsel %vm763_vm4, %v741_v25, %v773_v29 }
 0x2c7   : > { %v1273_v33 = vpop.f32.mrb[4].mxu0  ;;  %v779_v35 = vsel %vm761_vm6, %v733_v28, %v771_v30  ;;  %v787_v36 = vpack.c.bf16 %v781_v32, %v780_v31 }
 0x2c8   : > { %v754_v37 = vadd.f32 %v1273_v33, %v1160_v17  ;;  %v745_v38 = vpop.f32.mrb[5].mxu0  ;;  %v786_v39 = vpack.c.bf16 %v779_v35, %v778_v34 }
 0x2c9   : > { %v746_v40 = vadd.f32 %v1160_v17, %v745_v38  ;;  %v1274_v41 = vpop.f32.mrb[6].mxu0 }
 0x2ca   : > { %v776_v42 = vmul.f32 %v769_v19, %v754_v37  ;;  %v757_v43 = vadd.f32 %v1274_v41, %v1160_v17  ;;  %v748_v44 = vpop.f32.mrb[7].mxu0  ;;  %1291 = vmatprep.mubr.bf16.mxu1 %v786_v39  ;;  %vm766_vm7 = vcmp.gt.f32.partialorder %v754_v37, 0.0 }
 0x2cb   : > { %v774_v45 = vmul.f32 %v769_v19, %v746_v40  ;;  %v749_v46 = vadd.f32 %v1160_v17, %v748_v44  ;;  %1292 = vmatmul.mubr.bf16.vlgmr.msra.gmra.mrb[0].mxu1 %v787_v36  ;;  %vm764_vm8 = vcmp.gt.f32.partialorder %v746_v40, 0.0 }
 0x2cc   : > { %vm767_vm9 = vcmp.gt.f32.partialorder %v757_v43, 0.0  ;;  %v777_v47 = vmul.f32 %v769_v19, %v757_v43  ;;  %v784_v49 = vsel %vm766_vm7, %v754_v37, %v776_v42 }
 0x2cd   : > { %vm765_vm10 = vcmp.gt.f32.partialorder %v749_v46, 0.0  ;;  %v775_v48 = vmul.f32 %v769_v19, %v749_v46  ;;  %v782_v51 = vsel %vm764_vm8, %v746_v40, %v774_v45 }
 0x2ce   : > { %v785_v50 = vsel %vm767_vm9, %v757_v43, %v777_v47 }
 0x2cf   : > { %v783_v52 = vsel %vm765_vm10, %v749_v46, %v775_v48  ;;  %v789_v53 = vpack.c.bf16 %v785_v50, %v784_v49 }
 0x2d0   : > { %v788_v54 = vpack.c.bf16 %v783_v52, %v782_v51 }
 0x2d2   : > { %1295 = vmatprep.mubr.bf16.mxu1 %v788_v54 }
 0x2d3   : > { %1296 = vmatmul.mubr.bf16.gmra.mrb[4].mxu1 %v789_v53 }
 0x39e   : > { %v1293_v56 = vpop.f32.mrb[0].mxu1 }
 0x39f   : > { %v904_v58 = vadd.f32 %v1293_v56, %v1169_v55  ;;  %v895_v59 = vpop.f32.mrb[1].mxu1 }
 0x3a0   : > { %v896_v60 = vadd.f32 %v1169_v55, %v895_v59  ;;  %v1294_v61 = vpop.f32.mrb[2].mxu1 }
 0x3a1   : > { %vm928_vm11 = vcmp.gt.f32.partialorder %v904_v58, 0.0  ;;  %v938_v62 = vmul.f32 %v935_v57, %v904_v58  ;;  %v907_v63 = vadd.f32 %v1294_v61, %v1169_v55  ;;  %v898_v0 = vpop.f32.mrb[3].mxu1 }
 0x3a2   : > { %vm926_vm12 = vcmp.gt.f32.partialorder %v896_v60, 0.0  ;;  %v936_v1 = vmul.f32 %v935_v57, %v896_v60  ;;  %v899_v2 = vadd.f32 %v1169_v55, %v898_v0 }
 0x3a3   : > { %v946_v3 = vsel %vm928_vm11, %v904_v58, %v938_v62  ;;  %vm929_vm13 = vcmp.gt.f32.partialorder %v907_v63, 0.0  ;;  %v939_v4 = vmul.f32 %v935_v57, %v907_v63 }
 0x3a4   : > { %954 = vst [vmem:[%s2189_s26 + $0x10] sm:$0xff] %v946_v3  ;;  %v944_v5 = vsel %vm926_vm12, %v896_v60, %v936_v1  ;;  %vm927_vm14 = vcmp.gt.f32.partialorder %v899_v2, 0.0  ;;  %v937_v6 = vmul.f32 %v935_v57, %v899_v2 }
 0x3a5   : > { %952 = vst [vmem:[%s2189_s26] sm:$0xff] %v944_v5  ;;  %v947_v7 = vsel %vm929_vm13, %v907_v63, %v939_v4 }
 0x3a6   : > { %955 = vst [vmem:[%s2189_s26 + $0x18] sm:$0xff] %v947_v7  ;;  %v945_v8 = vsel %vm927_vm14, %v899_v2, %v937_v6  ;;  %v1297_v9 = vpop.f32.mrb[4].mxu1 }
 0x3a7   : > { %953 = vst [vmem:[%s2189_s26 + $0x8] sm:$0xff] %v945_v8  ;;  %v920_v10 = vadd.f32 %v1297_v9, %v1169_v55  ;;  %v911_v11 = vpop.f32.mrb[5].mxu1 }
 0x3a8   : > { %v912_v12 = vadd.f32 %v1169_v55, %v911_v11  ;;  %v1298_v13 = vpop.f32.mrb[6].mxu1 }
 0x3a9   : > { %vm932_vm15 = vcmp.gt.f32.partialorder %v920_v10, 0.0  ;;  %v942_v14 = vmul.f32 %v935_v57, %v920_v10  ;;  %v923_v15 = vadd.f32 %v1298_v13, %v1169_v55  ;;  %v914_v16 = vpop.f32.mrb[7].mxu1 }
 0x3aa   : > { %vm930_vm0 = vcmp.gt.f32.partialorder %v912_v12, 0.0  ;;  %v940_v17 = vmul.f32 %v935_v57, %v912_v12  ;;  %v915_v18 = vadd.f32 %v1169_v55, %v914_v16 }
 0x3ab   : > { %v950_v19 = vsel %vm932_vm15, %v920_v10, %v942_v14  ;;  %vm933_vm1 = vcmp.gt.f32.partialorder %v923_v15, 0.0  ;;  %v943_v20 = vmul.f32 %v935_v57, %v923_v15 }
 0x3ac   : > { %958 = vst [vmem:[%s2189_s26 + $0x30] sm:$0xff] %v950_v19  ;;  %v948_v21 = vsel %vm930_vm0, %v912_v12, %v940_v17  ;;  %vm931_vm2 = vcmp.gt.f32.partialorder %v915_v18, 0.0  ;;  %v941_v22 = vmul.f32 %v935_v57, %v915_v18 }
 0x3ad   : > { %956 = vst [vmem:[%s2189_s26 + $0x20] sm:$0xff] %v948_v21  ;;  %v951_v23 = vsel %vm933_vm1, %v923_v15, %v943_v20 }
 0x3ae   : > { %959 = vst [vmem:[%s2189_s26 + $0x38] sm:$0xff] %v951_v23  ;;  %v949_v24 = vsel %vm931_vm2, %v915_v18, %v941_v22 }
 0x3af   : > { %957 = vst [vmem:[%s2189_s26 + $0x28] sm:$0xff] %v949_v24 }
 0x3b0 PF: > { %s2230_s4 = scalar_lea.sflag [#allocation5], %s397_s10  ;;  %s2397_s11 = sld [smem:[#allocation32_spill]] }
 0x3b6   : > { %p2398_p3 = scmp.ne.s32.totalorder %s2397_s11, 0 }
 0x3b7   : > { %s2399_s18 = sld [smem:[#allocation25_spill]] (%p2398_p3) }
 0x3b8   : > { %967 = sbr.rel (!%p2398_p3) target bundleno = 990 (0x3de), region = 80 }
 0x3bd   : > { %s1180_s22 = sshll.u32 (%p2398_p3), %s2399_s18, 3 }
 0x3be   : > { %s969_s20 = ssub.s32 (%p2398_p3), 25, %s1180_s22 }
 0x3bf   : > { %p970_p10 = scmp.lt.s32.totalorder %s969_s20, 8 }
 0x3c1   : > { %s2431_s20 = smov (!%p970_p10, %s969_s20), 8 }
 0x3c2   : > { %s2235_s24 = sshll.u32 %s2431_s20, 7 }
 0x3c3   : > { %s974_s15 = ssub.s32 1024, %s2235_s24 }
 0x3c4   : > { %975 = vsyncadd %s2230_s4, %s974_s15  ;;  %p1182_p2 = scmp.ne.s32.totalorder %s2235_s24, 0  ;;  %s1190_s10 = sshll.u32 %s2399_s18, 10 }
 0x3c5   : > { %s2400_s7 = sld [smem:[#allocation36_spill]]  ;;  %s980_s25 = sshll.u32 %s2189_s26, 4  ;;  %s2247_s25 = int_to_ptr.vmem [resolvable:$true] %s980_s25 }
 0x3c6   : > { %s1627_s28 = scalar_lea.vmem %s2247_s25, %s2235_s24  ;;  %s1805_s19 = smov [#allocation13]  }
 0x3c7   : > { %p1628_p1 = scmp.ne.s32.totalorder %s2247_s25, %s1627_s28  ;;  %s1631_s17 = sshll.u32 %s1805_s19, 4  ;;  %s1632_s17 = int_to_ptr.vmem [resolvable:$false] %s1631_s17 }
 0x3c8   : > { %s1633_s30 = scalar_lea.vmem %s1632_s17, 2048  ;;  %p1634_p8 = scmp.lt.s32.totalorder %s2247_s25, %s1632_s17 }
 0x3c9   : > { %p1629_p9 = pnand %p1628_p1, %p1182_p2  ;;  %p1635_p12 = scmp.lt.s32.totalorder %s1633_s30, %s1627_s28 }
 0x3cb   : > { %s2244_s6 = scalar_lea.hbm %s2400_s7, %s1190_s10  ;;  %p1630_p6 = pneg %p1629_p9 }
 0x3cc   : > { %p1636_p13 = por %p1635_p12, %p1634_p8 }
 0x3ce   : > { %p1637_p5 = pnand %p1636_p13, %p1630_p6 }
 0x3d0   : > { %1640 = shalt.err (!%p1637_p5)
}
 0x3d1   : > { %s1641_s26 = scalar_lea.hbm %s2244_s6, %s2235_s24  ;;  %s1645_s11 = scalar_lea.hbm %s2400_s7, 3200 }
 0x3d2   : > { %p1642_p4 = scmp.ne.s32.totalorder %s2244_s6, %s1641_s26  ;;  %p1646_p0 = scmp.lt.u32.totalorder %s2244_s6, %s2400_s7 }
 0x3d3   : > { %p1647_p3 = scmp.lt.u32.totalorder %s1645_s11, %s1641_s26  ;;  %p1649_p1 = scmp.lt.u32.totalorder %s1641_s26, %s2244_s6 }
 0x3d4   : > { %p1643_p7 = pnand %p1642_p4, %p1182_p2 }
 0x3d5   : > { %p1648_p10 = por %p1647_p3, %p1646_p0 }
 0x3d6   : > { %p1644_p11 = pneg %p1643_p7 }
 0x3d7   : > { %p1650_p9 = por %p1649_p1, %p1648_p10 }
 0x3d9   : > { %p1651_p6 = pnand %p1650_p9, %p1644_p11 }
 0x3db   : > { %1654 = shalt.err (!%p1651_p6)
}
 0x3dc   : > { %s1806_s20 = smov 128   ;;  %s1807_s15 = smov 8  }
 0x3dd   : > { %986 = dma.vmem_to_hbm [thread:$0]  (%p1182_p2), %s2247_s25, %s2235_s24, %s2244_s6, %s2230_s4, %s1806_s20, %s1806_s20, %s1807_s15  }
 0x3de PF: > { %s2401_s10 = sld [smem:[#allocation20_spill]]  ;;  %s2402_s27 = sld [smem:[#allocation33_spill]] }
 0x3df   : > { %p1351_p8 = scmp.ge.s32.totalorder %s1789_s14, 2 }
 0x3e4   : > { %s995_s23 = sand.u32 1, %s2401_s10   ;;  %p2403_p12 = scmp.ne.s32.totalorder %s2402_s27, 0 }
 0x3e5   : > { %s996_s28 = scalar_lea.sflag [#allocation5], %s995_s23 }
 0x3e6   : > { %p1342_p13 = pnand %p1351_p8, %p2403_p12 }
 0x3e8   : > { %1732 = dma.done.wait (!%p1342_p13), %s996_s28, 1024  }
 0x3e9   : > { %1734 = vsyncadd (!%p1342_p13), %s996_s28, 4294966272  ;;  %s28_s14 = sadd.s32 1, %s1789_s14   ;;  %s2405_s24 = sld [smem:[#allocation21_spill]] }
 0x3ea   : > { %p2279_p5 = scmp.ge.s32.totalorder %s28_s14, 10   ;;  %s2406_s25 = sld [smem:[#allocation22_spill]] }
 0x3eb   : > { %s2407_s26 = sld [smem:[#allocation31_spill]]  ;;  %s2408_s27 = sld [smem:[#allocation23_spill]] }
 0x3ec   : > { %s2409_s4 = sld [smem:[#allocation28_spill]]  ;;  %s2410_s6 = sld [smem:[#allocation29_spill]] }
 0x3ed   : > { %s2411_s17 = sld [smem:[#allocation26_spill]]  ;;  %s2412_s21 = sld [smem:[#allocation27_spill]] }
 0x3ee   : > { %s2413_s28 = smov %s1757_s29  ;;  %s2415_s30 = smov %s1765_s8 }
 0x3ef   : > { %s2416_s8 = smov %s1769_s9  ;;  %s2418_s10 = smov %s1781_s12 }
 0x3f0   : > { %s2419_s11 = smov %s1785_s13  ;;  %27 = sbr.rel (!%p2279_p5) target bundleno = 18 (0x12), region = 127 }
 0x3f2   : > { %s2414_s29 = smov %s2409_s4  ;;  %s2417_s9 = smov %s2410_s6 }
 0x3f3   : > { %s2420_s12 = smov %s2411_s17  ;;  %s2421_s13 = smov %s2412_s21 }
 0x3f7   :  { %1001 = vsyncpa [#allocation4], 1 }
 0x3f8   :  { %1003 = vsyncpa [#allocation4 + $0x1], 1 }
 0x3f9   :  { %1004 = vsyncpa [#allocation9], 1 }
 0x3fa   :  { %1006 = vsyncpa [#allocation9 + $0x1], 1 }
 0x3fb   :  { %1007 = vsyncpa [#allocation12], 1 }
 0x3fc   :  { %1008 = vsyncpa [#allocation5], 1 }
 0x3fd   :  { %1010 = vsyncpa [#allocation5 + $0x1], 1 }
 0x3fe   :  { %1011 = vsyncpa [#allocation6], 1 }
 0x3ff   :  { %1013 = vsyncpa [#allocation6 + $0x1], 1 }

// kernel: tpu_custom_call.1
= control target key start
LH: loop header
LB: loop body
LE: loop exit
PB: predicated region body
PF: predicated region fallthrough
CT: control target
= control target key end

     0   :  { %s2326_s0 = inlined_call_operand.hbm [shape: f32[2], index: 0, kind: input, shape index: {}]   ;;  %s2327_s1 = inlined_call_operand.hbm [shape: f32[200,200], index: 1, kind: input, shape index: {}]   ;;  %s2328_s2 = inlined_call_operand.hbm [shape: bf16[256,128], index: 2, kind: input, shape index: {}]   ;;  %s2329_s3 = inlined_call_operand.hbm [shape: bf16[128,128], index: 3, kind: input, shape index: {}]   ;;  %s2330_s4 = inlined_call_operand.vmem [shape: f32[1,128], index: 4, kind: input, shape index: {}]   ;;  %s2331_s5 = inlined_call_operand.hbm [shape: bf16[128,128], index: 5, kind: input, shape index: {}]   ;;  %s2332_s6 = inlined_call_operand.vmem [shape: f32[1,128], index: 6, kind: input, shape index: {}]   ;;  %s2333_s7 = inlined_call_operand.hbm [shape: f32[200,128], index: 7, kind: output, shape index: {}]  }
   0x1   :  { %2352 = sst [smem:[#allocation34_spill]] %s2330_s4 }
   0x2   :  { %2353 = sst [smem:[#allocation35_spill]] %s2332_s6 }
   0x3   :  { %2354 = sst [smem:[#allocation36_spill]] %s2333_s7 }
   0x4   :  { %12 = vsyncpa [#allocation6], 0 }
   0x5   :  { %13 = vsyncpa [#allocation4], 0 }
   0x6   :  { %15 = vsyncpa [#allocation4 + $0x1], 0 }
   0x7   :  { %16 = vsyncpa [#allocation9], 0 }
   0x8   :  { %18 = vsyncpa [#allocation9 + $0x1], 0 }
   0x9   :  { %19 = vsyncpa [#allocation12], 0 }
   0xa   :  { %20 = vsyncpa [#allocation5], 0 }
   0xb   :  { %22 = vsyncpa [#allocation5 + $0x1], 0  ;;  %s1848_s24 = smov 0   ;;  %s1850_s25 = smov 0  }
   0xc   :  { %s1852_s26 = smov 0   ;;  %s1854_s27 = smov 0  }
   0xd   :  { %s1856_s28 = smov 0   ;;  %s1858_s29 = smov 0  }
   0xe   :  { %s1860_s30 = smov 0   ;;  %s1862_s8 = smov 0  }
   0xf   :  { %s1864_s9 = smov 0   ;;  %s1866_s10 = smov 0  }
  0x10   :  { %s1868_s11 = smov 0   ;;  %s1870_s12 = smov 0  }
  0x11   :  { %s1872_s13 = smov 0   ;;  %s1874_s14 = smov 0  }
  0x12 LB: > { %2355 = sst [smem:[#allocation20_spill]] %s1737_s24  ;;  %s1917_s15 = sadd.s32 4294967295, %s1789_s14   ;;  %s1789_s14 = sphi %s1874_s14, %s28_s14   ;;  %s1785_s13 = sphi %s1872_s13, %s2421_s13   ;;  %s1781_s12 = sphi %s1870_s12, %s2420_s12   ;;  %s1777_s11 = sphi %s1868_s11, %s2419_s11   ;;  %s1773_s10 = sphi %s1866_s10, %s2418_s10   ;;  %s1769_s9 = sphi %s1864_s9, %s2417_s9   ;;  %s1765_s8 = sphi %s1862_s8, %s2416_s8   ;;  %s1761_s30 = sphi %s1860_s30, %s2415_s30   ;;  %s1757_s29 = sphi %s1858_s29, %s2414_s29   ;;  %s1753_s28 = sphi %s1856_s28, %s2413_s28   ;;  %s1749_s27 = sphi %s1854_s27, %s2408_s27   ;;  %s1745_s26 = sphi %s1852_s26, %s2407_s26   ;;  %s1741_s25 = sphi %s1850_s25, %s2406_s25   ;;  %s1737_s24 = sphi %s1848_s24, %s2405_s24  }
  0x13   : > { %2356 = sst [smem:[#allocation21_spill]] %s1741_s25  ;;  %s37_s17 = sadd.s32 1, %s1781_s12 }
  0x14   : > { %2357 = sst [smem:[#allocation22_spill]] %s1745_s26  ;;  %s40_s18 = sadd.s32 1, %s1785_s13 }
  0x15   : > { %2358 = sst [smem:[#allocation23_spill]] %s1753_s28  ;;  %p38_p0 = scmp.ge.s32.totalorder %s37_s17, 2 }
  0x16   : > { %2359 = sst [smem:[#allocation24_spill]] %s1773_s10  ;;  %s70_s19 = sadd.s32 1, %s1769_s9 }
  0x17   : > { %2360 = sst [smem:[#allocation25_spill]] %s1777_s11  ;;  %p77_p1 = scmp.ne.s32.totalorder %s1769_s9, %s1765_s8 }
  0x18   : > { %p78_p2 = scmp.eq.s32.totalorder %s1789_s14, 0  ;;  %s2423_s17 = smov (%p38_p0, %s37_s17), 0 }
  0x19   : > { %2361 = sst [smem:[#allocation26_spill]] %s2423_s17  ;;  %s2425_s18 = smov (!%p38_p0, %s40_s18), %s1785_s13 }
  0x1a   : > { %s66_s20 = ssub.s32 %s1781_s12, %s2423_s17  ;;  %p1933_p3 = por %p78_p2, %p77_p1 }
  0x1b   : > { %p42_p4 = scmp.ge.s32.totalorder %s2425_s18, 4  ;;  %p83_p5 = scmp.ne.s32.totalorder %s1765_s8, %s1761_s30 }
  0x1c   : > { %p2337_p6 = scmp.eq.s32.totalorder %s1917_s15, 0  ;;  %p94_p7 = scmp.eq.s32.totalorder %s66_s20, 0 }
  0x1d   : > { %s2427_s18 = smov (%p42_p4, %s2425_s18), 0  ;;  %s96_s23 = sadd.s32 1, %s1757_s29 }
  0x1e   : > { %2363 = sst [smem:[#allocation27_spill]] %s2427_s18  ;;  %p1943_p8 = por %p2337_p6, %p83_p5 }
  0x1f   : > { %s65_s30 = ssub.s32 %s1785_s13, %s2427_s18  ;;  %p103_p9 = scmp.ne.s32.totalorder %s1757_s29, %s1753_s28 }
  0x20   : > { %s2364_s22 = scalar_select %p1943_p8, 1, 0 }
  0x21   : > { %s67_s16 = sor.u32 %s66_s20, %s65_s30  ;;  %p109_p10 = scmp.ne.s32.totalorder %s1753_s28, %s1749_s27 }
  0x22   : > { %p68_p11 = scmp.eq.s32.totalorder %s67_s16, 0  ;;  %p1956_p12 = por %p103_p9, %p78_p2 }
  0x23   : > { %s1961_s7 = scalar_select %p94_p7, %s1757_s29, %s96_s23  }
  0x24   : > { %s1964_s11 = scalar_select %p68_p11, %s1769_s9, %s70_s19  }
  0x25   : > { %2366 = sst [smem:[#allocation28_spill]] %s1961_s7  ;;  %p1968_p13 = por %p109_p10, %p2337_p6 }
  0x26   : > { %2367 = sst [smem:[#allocation29_spill]] %s1964_s11  ;;  %p204_p0 = scmp.eq.s32.totalorder %s65_s30, 0 }
  0x27   : > { %s2368_s6 = scalar_select %p1968_p13, 1, 0 }
  0x28   : > { %s206_s20 = sadd.s32 1, %s1745_s26  ;;  %p216_p1 = scmp.ne.s32.totalorder %s1745_s26, %s1741_s25 }
  0x29   : > { %2369 = sst [smem:[#allocation30_spill]] %s2368_s6  ;;  %p217_p4 = scmp.eq.s32.totalorder %s1917_s15, 7 }
  0x2a   : > { %s1976_s27 = scalar_select %p204_p0, %s1745_s26, %s206_s20  }
  0x2b   : > { %p222_p2 = scmp.ne.s32.totalorder %s1741_s25, %s1737_s24  ;;  %s2371_s16 = sadd.s32 4294967294, %s1789_s14  }
  0x2c   : > { %2370 = sst [smem:[#allocation31_spill]] %s1976_s27  ;;  %p223_p5 = scmp.eq.s32.totalorder %s2371_s16, 7 }
  0x2d   : > { %p1122_p9 = scmp.ge.s32.totalorder %s1789_s14, 1  ;;  %p1984_p7 = por %p217_p4, %p216_p1 }
  0x2e   : > { %p230_p11 = scmp.lt.s32.totalorder %s1789_s14, 9  ;;  %p1989_p10 = por %p223_p5, %p222_p2 }
  0x2f   : > { %s2372_s23 = scalar_select %p1984_p7, 1, 0 }
  0x30   : > { %s2374_s19 = scalar_select %p1989_p10, 1, 0 }
  0x31   : > { %2373 = sst [smem:[#allocation32_spill]] %s2372_s23  ;;  %p1993_p6 = pnand %p1122_p9, %p230_p11 }
  0x32   : > { %2375 = sst [smem:[#allocation33_spill]] %s2374_s19  ;;  %s1791_s20 = smov [#allocation10]  }
  0x33   : > { %s2376_s30 = scalar_select %p1993_p6, 1, 0 }
  0x34   : > { %p1331_p0 = pneg %p1993_p6  ;;  %s251_s18 = sshll.u32 %s1791_s20, 4  ;;  %s1999_s18 = int_to_ptr.vmem [resolvable:$true] %s251_s18 }
  0x35   : > { %p2377_p1 = scmp.eq.s32.totalorder %s1917_s15, 0  ;;  %s1792_s11 = smov [#allocation11]  }
  0x36   : > { %s267_s7 = sshll.u32 %s1792_s11, 4  ;;  %s1502_s19 = scalar_lea.hbm %s2326_s0, 16  ;;  %s2007_s7 = int_to_ptr.vmem [resolvable:$true] %s267_s7 }
  0x37   : > { %p2003_p4 = pnand %p1331_p0, %p2377_p1  ;;  %p1503_p2 = scmp.ne.s32.totalorder %s2326_s0, %s1502_s19 }
  0x38   : > { %p1509_p0 = scmp.lt.u32.totalorder %s1502_s19, %s2326_s0 }
  0x39   : > { %p2017_p5 = pneg %p2003_p4 }
  0x3b   : > { %p1505_p9 = pnand %p2017_p5, %p1503_p2 }
  0x3d   : > { %p1506_p11 = pneg %p1505_p9 }
  0x3f   : > { %p1511_p1 = pnand %p1509_p0, %p1506_p11 }
  0x41   : > { %1514 = shalt.err (!%p1511_p1)
}
  0x42   : > { %s1793_s26 = smov [#allocation3]   ;;  %s1515_s25 = scalar_lea.hbm %s2329_s3, 1024 }
  0x43   : > { %1334 = dma.hbm_to_smem (!%p2003_p4), %s2326_s0, 16, %s1793_s26, [#allocation6]  }
  0x44   : > { %p1516_p2 = scmp.ne.s32.totalorder %s2329_s3, %s1515_s25  ;;  %p1522_p0 = scmp.lt.u32.totalorder %s1515_s25, %s2329_s3 }
  0x46   : > { %p1518_p9 = pnand %p1516_p2, %p2017_p5 }
  0x48   : > { %p1519_p11 = pneg %p1518_p9 }
  0x4a   : > { %p1524_p1 = pnand %p1522_p0, %p1519_p11 }
  0x4c   : > { %1527 = shalt.err (!%p1524_p1)
}
  0x4d   : > { %s1528_s11 = scalar_lea.vmem %s1999_s18, 1024  ;;  %p1536_p8 = scmp.lt.s32.totalorder %s1999_s18, %s1999_s18 }
  0x4e   : > { %p1529_p10 = scmp.ne.s32.totalorder %s1999_s18, %s1528_s11  ;;  %p1537_p6 = scmp.lt.s32.totalorder %s1528_s11, %s1528_s11 }
  0x50   : > { %p1531_p7 = pnand %p1529_p10, %p2017_p5  ;;  %p1538_p2 = por %p1537_p6, %p1536_p8 }
  0x52   : > { %p1532_p13 = pneg %p1531_p7 }
  0x54   : > { %p1539_p9 = pnand %p1538_p2, %p1532_p13 }
  0x56   : > { %1542 = shalt.err (!%p1539_p9)
}
  0x57   : > { %s1794_s6 = smov 64   ;;  %s1795_s25 = smov 4  }
  0x58   : > { %1337 = dma.hbm_to_vmem [thread:$0]  (!%p2003_p4), %s2329_s3, 1024, %s1999_s18, [#allocation9], %s1794_s6, %s1794_s6, %s1795_s25  }
  0x59   : > { %s1543_s27 = scalar_lea.hbm %s2331_s5, 1024 }
  0x5a   : > { %p1544_p6 = scmp.ne.s32.totalorder %s2331_s5, %s1543_s27  ;;  %p1550_p7 = scmp.lt.u32.totalorder %s1543_s27, %s2331_s5 }
  0x5c   : > { %p1546_p8 = pnand %p1544_p6, %p2017_p5 }
  0x5e   : > { %p1547_p13 = pneg %p1546_p8 }
  0x60   : > { %p1552_p10 = pnand %p1550_p7, %p1547_p13 }
  0x62   : > { %1555 = shalt.err (!%p1552_p10)
}
  0x63   : > { %s1556_s18 = scalar_lea.vmem %s2007_s7, 1024  ;;  %p1564_p2 = scmp.lt.s32.totalorder %s2007_s7, %s2007_s7 }
  0x64   : > { %p1557_p11 = scmp.ne.s32.totalorder %s2007_s7, %s1556_s18  ;;  %p1565_p9 = scmp.lt.s32.totalorder %s1556_s18, %s1556_s18 }
  0x66   : > { %p1559_p0 = pnand %p1557_p11, %p2017_p5  ;;  %p1566_p6 = por %p1565_p9, %p1564_p2 }
  0x68   : > { %p1560_p1 = pneg %p1559_p0 }
  0x6a   : > { %p1567_p8 = pnand %p1566_p6, %p1560_p1 }
  0x6c   : > { %1570 = shalt.err (!%p1567_p8)
}
  0x6d   : > { %1340 = dma.hbm_to_vmem [thread:$0]  (!%p2003_p4), %s2331_s5, 1024, %s2007_s7, [#allocation12], %s1794_s6, %s1794_s6, %s1795_s25  }
  0x6e   : > { %p1126_p13 = scmp.ge.s32.totalorder %s1789_s14, 8 }
  0x70   : > { %280 = sbr.rel (%p1126_p13) target bundleno = 183 (0xb7), region = 36 }
  0x77   : > { %283 = sbr.rel (!%p1933_p3) target bundleno = 156 (0x9c), region = 40  ;;  %s284_s20 = sand.u32 (%p1933_p3), 1, %s1769_s9  }
  0x78   : > { %s1128_s26 = sshll.u32 (%p1933_p3), %s1785_s13, 3  ;;  %s1127_s24 = sshll.u32 (%p1933_p3), %s284_s20, 6 }
  0x79   : > { %s290_s27 = ssub.s32 (%p1933_p3), 25, %s1128_s26  ;;  %s2085_s4 = scalar_lea.sflag (%p1933_p3), [#allocation4], %s284_s20 }
  0x7a   : > { %p291_p5 = scmp.lt.s32.totalorder (%p1933_p3), %s290_s27, 8  ;;  %s288_s7 = scalar_lea.vmem (%p1933_p3), [#allocation7], %s1127_s24 }
  0x7e   : > { %s2429_s27 = smov (!%p291_p5, %s290_s27), 8 }
  0x7f   : > { %s2082_s16 = sshll.u32 %s2429_s27, 7 }
  0x80   : > { %s295_s23 = ssub.s32 1024, %s2082_s16 }
  0x81   : > { %296 = vsyncadd %s2085_s4, %s295_s23  ;;  %p1130_p3 = scmp.ne.s32.totalorder %s2082_s16, 0  ;;  %s1188_s21 = sshll.u32 %s1785_s13, 4 }
  0x82   : > { %s299_s6 = sadd.s32 %s1781_s12, %s1188_s21  ;;  %s303_s25 = sshll.u32 %s288_s7, 4  ;;  %s2091_s25 = int_to_ptr.vmem [resolvable:$true] %s303_s25 }
  0x83   : > { %s1132_s19 = sshll.u32 %s299_s6, 7  ;;  %s1575_s24 = scalar_lea.hbm %s2327_s1, 6400 }
  0x84   : > { %s2096_s28 = scalar_lea.hbm %s2327_s1, %s1132_s19 }
  0x85   : > { %s1571_s10 = scalar_lea.hbm %s2096_s28, %s2082_s16  ;;  %p1576_p11 = scmp.lt.u32.totalorder %s2096_s28, %s2327_s1 }
  0x86   : > { %p1572_p4 = scmp.ne.s32.totalorder %s2096_s28, %s1571_s10  ;;  %p1577_p0 = scmp.lt.u32.totalorder %s1575_s24, %s1571_s10 }
  0x87   : > { %p1579_p2 = scmp.lt.u32.totalorder %s1571_s10, %s2096_s28 }
  0x88   : > { %p1573_p7 = pnand %p1572_p4, %p1130_p3  ;;  %p1578_p1 = por %p1577_p0, %p1576_p11 }
  0x8a   : > { %p1574_p10 = pneg %p1573_p7  ;;  %p1580_p9 = por %p1579_p2, %p1578_p1 }
  0x8c   : > { %p1581_p6 = pnand %p1580_p9, %p1574_p10 }
  0x8e   : > { %1584 = shalt.err (!%p1581_p6)
}
  0x8f   : > { %s1585_s7 = scalar_lea.vmem %s2091_s25, %s2082_s16  ;;  %s1796_s21 = smov [#allocation7]  }
  0x90   : > { %p1586_p8 = scmp.ne.s32.totalorder %s2091_s25, %s1585_s7  ;;  %s1589_s6 = sshll.u32 %s1796_s21, 4  ;;  %s1590_s6 = int_to_ptr.vmem [resolvable:$false] %s1589_s6 }
  0x91   : > { %s1591_s19 = scalar_lea.vmem %s1590_s6, 2048  ;;  %p1592_p4 = scmp.lt.s32.totalorder %s2091_s25, %s1590_s6 }
  0x92   : > { %p1587_p13 = pnand %p1586_p8, %p1130_p3  ;;  %p1593_p7 = scmp.lt.s32.totalorder %s1591_s19, %s1585_s7 }
  0x94   : > { %p1588_p5 = pneg %p1587_p13  ;;  %p1594_p11 = por %p1593_p7, %p1592_p4 }
  0x96   : > { %p1595_p0 = pnand %p1594_p11, %p1588_p5 }
  0x98   : > { %1598 = shalt.err (!%p1595_p0)
}
  0x99   : > { %s1797_s11 = smov 256   ;;  %s1798_s18 = smov 128  }
  0x9a   : > { %s1799_s10 = smov 8  }
  0x9b   : > { %309 = dma.hbm_to_vmem [thread:$0]  (%p1130_p3), %s2096_s28, %s2082_s16, %s2091_s25, %s2085_s4, %s1797_s11, %s1798_s18, %s1799_s10  }
  0x9c PF: > { %s313_s20 = sand.u32 1, %s1789_s14   ;;  %s315_s26 = sand.u32 1, %s1757_s29  }
  0x9d   : > { %s1135_s24 = sshll.u32 %s315_s26, 6  ;;  %s1189_s27 = sshll.u32 %s1781_s12, 10 }
  0x9e   : > { %s2129_s21 = scalar_lea.hbm %s2328_s2, %s1189_s27  ;;  %s317_s6 = scalar_lea.vmem [#allocation8], %s1135_s24 }
  0x9f   : > { %s324_s16 = sshll.u32 %s317_s6, 4  ;;  %s2133_s4 = scalar_lea.sflag [#allocation9], %s313_s20  ;;  %s2131_s16 = int_to_ptr.vmem [resolvable:$true] %s324_s16 }
  0xa0   : > { %s1599_s25 = scalar_lea.hbm %s2129_s21, 1024  ;;  %s1603_s11 = scalar_lea.hbm %s2328_s2, 2048 }
  0xa1   : > { %p1600_p3 = scmp.ne.s32.totalorder %s2129_s21, %s1599_s25  ;;  %p1604_p2 = scmp.lt.u32.totalorder %s2129_s21, %s2328_s2 }
  0xa2   : > { %p1605_p9 = scmp.lt.u32.totalorder %s1603_s11, %s1599_s25  ;;  %p1607_p8 = scmp.lt.u32.totalorder %s1599_s25, %s2129_s21 }
  0xa3   : > { %p1601_p10 = pnand %p1600_p3, %p1956_p12 }
  0xa4   : > { %p1606_p6 = por %p1605_p9, %p1604_p2 }
  0xa5   : > { %p1602_p1 = pneg %p1601_p10 }
  0xa6   : > { %p1608_p13 = por %p1607_p8, %p1606_p6 }
  0xa8   : > { %p1609_p5 = pnand %p1608_p13, %p1602_p1 }
  0xaa   : > { %1612 = shalt.err (!%p1609_p5)
}
  0xab   : > { %s1613_s20 = scalar_lea.vmem %s2131_s16, 1024  ;;  %s1800_s26 = smov [#allocation8]  }
  0xac   : > { %p1614_p4 = scmp.ne.s32.totalorder %s2131_s16, %s1613_s20  ;;  %s1617_s24 = sshll.u32 %s1800_s26, 4  ;;  %s1618_s24 = int_to_ptr.vmem [resolvable:$false] %s1617_s24 }
  0xad   : > { %s1619_s27 = scalar_lea.vmem %s1618_s24, 2048  ;;  %p1620_p0 = scmp.lt.s32.totalorder %s2131_s16, %s1618_s24 }
  0xae   : > { %p1615_p7 = pnand %p1614_p4, %p1956_p12  ;;  %p1621_p3 = scmp.lt.s32.totalorder %s1619_s27, %s1613_s20 }
  0xb0   : > { %p1616_p11 = pneg %p1615_p7  ;;  %p1622_p10 = por %p1621_p3, %p1620_p0 }
  0xb2   : > { %p1623_p2 = pnand %p1622_p10, %p1616_p11 }
  0xb4   : > { %1626 = shalt.err (!%p1623_p2)
}
  0xb5   : > { %s1801_s23 = smov 64   ;;  %s1802_s7 = smov 4  }
  0xb6   : > { %1321 = dma.hbm_to_vmem [thread:$0]  (%p1956_p12), %s2129_s21, 1024, %s2131_s16, %s2133_s4, %s1801_s23, %s1801_s23, %s1802_s7  }
  0xb7 PF: > { %p2380_p1 = scmp.ne.s32.totalorder %s2376_s30, 0 }
  0xb8   : > { %p2381_p9 = scmp.eq.s32.totalorder (!%p2380_p1), %s1917_s15, 0 }
  0xb9   : > { %336 = sbr.rel (%p2380_p1) target bundleno = 990 (0x3de), region = 48 }
  0xc0   : > { %1712 = dma.done.wait (%p2381_p9), [#allocation6], 16   ;;  %p2382_p6 = pmov %p2381_p9 }
  0xc1   : > { %s342_s6 = sand.u32 1, %s1765_s8   ;;  %p2383_p8 = scmp.ne.s32.totalorder %s2364_s22, 0 }
  0xc2   : > { %1714 = vsyncadd (%p2382_p6), [#allocation6], 4294967280  ;;  %s1140_s25 = sshll.u32 %s342_s6, 6  ;;  %s343_s28 = scalar_lea.sflag [#allocation4], %s342_s6 }
  0xc3   : > { %s2164_s19 = scalar_lea.vmem [#allocation7], %s1140_s25 }
  0xc4   : > { %1716 = dma.done.wait (%p2383_p8), %s343_s28, 1024  }
  0xc5   : > { %1718 = vsyncadd (%p2383_p8), %s343_s28, 4294966272  ;;  %s2384_s17 = sld [smem:[#allocation23_spill]]  ;;  %s2385_s30 = sld [smem:[#allocation30_spill]] }
  0xc6   : > { %s351_s21 = sand.u32 1, %s1917_s15  }
  0xc7   : > { %s352_s11 = scalar_lea.sflag [#allocation9], %s351_s21 }
  0xcb   : > { %s353_s16 = sand.u32 1, %s2384_s17   ;;  %p2386_p12 = scmp.ne.s32.totalorder %s2385_s30, 0 }
  0xcc   : > { %s1141_s4 = sshll.u32 %s353_s16, 6 }
  0xcd   : > { %s2172_s18 = scalar_lea.vmem [#allocation8], %s1141_s4 }
  0xce   : > { %1720 = dma.done.wait (%p2386_p12), %s352_s11, 1024  }
  0xcf   : > { %1722 = vsyncadd (%p2386_p12), %s352_s11, 4294966272  ;;  %p2387_p13 = pmov %p2382_p6 }
  0xd0   : > { %p2388_p5 = pmov %p2382_p6 }
  0xd1   : > { %1724 = dma.done.wait (%p2387_p13), [#allocation9], 1024  }
  0xd2   : > { %1726 = vsyncadd (%p2388_p5), [#allocation9], 4294966272  ;;  %p2389_p4 = pmov %p2388_p5 }
  0xd4   : > { %1728 = dma.done.wait (%p2389_p4), [#allocation12], 1024   ;;  %p2390_p7 = pmov %p2389_p4 }
  0xd6   : > { %1730 = vsyncadd (%p2390_p7), [#allocation12], 4294966272 }
  0xd7   : > { %368 = sfence }
  0xd8   : > { %s2391_s22 = sld [smem:[#allocation21_spill]]  ;;  %s2392_s24 = sld [smem:[#allocation24_spill]] }
  0xde   : > { %s397_s10 = sand.u32 1, %s2391_s22   ;;  %p1145_p11 = scmp.ne.s32.totalorder %s2392_s24, 0 }
  0xdf   : > { %s1144_s20 = sshll.u32 %s397_s10, 6  ;;  %v1803_v0 = vmov (!%p1145_p11), 0.0  }
  0xe0   : > { %s2189_s26 = scalar_lea.vmem [#allocation13], %s1144_s20  ;;  %417 = sbr.rel (%p1145_p11) target bundleno = 231 (0xe7), region = 72  ;;  %418 = vst [vmem:[#allocation2] sm:$0xff] (!%p1145_p11), %v1803_v0  ;;  %419 = vst [vmem:[#allocation2 + $0x8] sm:$0xff] (!%p1145_p11), %v1803_v0 }
  0xe1   : > { %420 = vst [vmem:[#allocation2 + $0x10] sm:$0xff] (!%p1145_p11), %v1803_v0  ;;  %421 = vst [vmem:[#allocation2 + $0x18] sm:$0xff] (!%p1145_p11), %v1803_v0 }
  0xe2   : > { %422 = vst [vmem:[#allocation2 + $0x20] sm:$0xff] (!%p1145_p11), %v1803_v0  ;;  %423 = vst [vmem:[#allocation2 + $0x28] sm:$0xff] (!%p1145_p11), %v1803_v0 }
  0xe3   : > { %424 = vst [vmem:[#allocation2 + $0x30] sm:$0xff] (!%p1145_p11), %v1803_v0  ;;  %425 = vst [vmem:[#allocation2 + $0x38] sm:$0xff] (!%p1145_p11), %v1803_v0 }
  0xe7 PF: > { %s2393_s15 = sld [smem:[#allocation24_spill]]  ;;  %v1478_v1 = vld [vmem:[%s2172_s18] sm:$0xff]   ;;  %v438_v2 = vlaneseq  ;;  %v1479_v3 = vld [vmem:[%s2172_s18 + $0x8] sm:$0xff]   ;;  %v1480_v6 = vld [vmem:[%s2172_s18 + $0x10] sm:$0xff]   ;;  %v1804_v13 = vmov 0  }
  0xe8   : > { %1227 = vmatprep.subr.bf16.mxu0 %v1478_v1  ;;  %1299 = vmatprep.subr.bf16.mxu1 %v1478_v1  ;;  %v1481_v9 = vld [vmem:[%s2172_s18 + $0x18] sm:$0xff]   ;;  %v426_v10 = vld [vmem:[%s2164_s19] sm:$0xff]  ;;  %v427_v11 = vld [vmem:[%s2164_s19 + $0x8] sm:$0xff] }
  0xe9   : > { %v439_v4 = vand.u32 127, %v438_v2  ;;  %1228 = vmatpush3.bf16.msra.mxu0 %v1478_v1  ;;  %1307 = vmatpush3.bf16.msra.mxu1 %v1478_v1  ;;  %v447_v7 = vshrl.u32 %v438_v2, 7  ;;  %v434_v12 = vpack.c.bf16 %v427_v11, %v426_v10  ;;  %v430_v15 = vld [vmem:[%s2164_s19 + $0x20] sm:$0xff]  ;;  %v431_v16 = vld [vmem:[%s2164_s19 + $0x28] sm:$0xff]  ;;  %v1484_v21 = vld [vmem:[%s2172_s18 + $0x30] sm:$0xff]  }
  0xea   : > { %1229 = vmatprep.subr.bf16.mxu0 %v1479_v3  ;;  %1300 = vmatprep.subr.bf16.mxu1 %v1479_v3  ;;  %v436_v18 = vpack.c.bf16 %v431_v16, %v430_v15  ;;  %v1482_v19 = vld [vmem:[%s2172_s18 + $0x20] sm:$0xff]   ;;  %v1483_v20 = vld [vmem:[%s2172_s18 + $0x28] sm:$0xff]   ;;  %v1485_v22 = vld [vmem:[%s2172_s18 + $0x38] sm:$0xff]  }
  0xeb   : > { %v448_v8 = vsub.s32 0, %v447_v7  ;;  %v428_v23 = vld [vmem:[%s2164_s19 + $0x10] sm:$0xff]  ;;  %v429_v24 = vld [vmem:[%s2164_s19 + $0x18] sm:$0xff]  ;;  %v455_v31 = vld [vmem:[#allocation2] sm:$0xff] }
  0xec   : > { %v432_v25 = vld [vmem:[%s2164_s19 + $0x30] sm:$0xff]  ;;  %v433_v26 = vld [vmem:[%s2164_s19 + $0x38] sm:$0xff]  ;;  %v435_v27 = vpack.c.bf16 %v429_v24, %v428_v23  ;;  %v459_v32 = vld [vmem:[#allocation2 + $0x20] sm:$0xff] }
  0xed   : > { %s1146_s27 = sshll.u32 %s2393_s15, 7  ;;  %1230 = vmatpush3.bf16.msra.mxu0 %v1479_v3  ;;  %1308 = vmatpush3.bf16.msra.mxu1 %v1479_v3  ;;  %v437_v28 = vpack.c.bf16 %v433_v26, %v432_v25  ;;  %v457_v29 = vld [vmem:[#allocation2 + $0x10] sm:$0xff]  ;;  %v458_v35 = vld [vmem:[#allocation2 + $0x18] sm:$0xff]  ;;  %v456_v41 = vld [vmem:[#allocation2 + $0x8] sm:$0xff]  ;;  %p1159_p0 = scmp.ne.s32.totalorder %s2393_s15, 1 }
  0xee   : > { %s441_s23 = ssub.s32 200, %s1146_s27  ;;  %1231 = vmatprep.subr.bf16.mxu0 %v1480_v6  ;;  %1301 = vmatprep.subr.bf16.mxu1 %v1480_v6  ;;  %v461_v30 = vld [vmem:[#allocation2 + $0x30] sm:$0xff]  ;;  %v462_v36 = vld [vmem:[#allocation2 + $0x38] sm:$0xff]  ;;  %v460_v42 = vld [vmem:[#allocation2 + $0x28] sm:$0xff]  ;;  %s768_s7 = sld [smem:[#allocation3]] (!%p1159_p0) }
  0xef   : > { %v442_v5 = vstv %s441_s23  ;;  %v1486_v53 = vld [vmem:[#allocation10] sm:$0xff] (!%p1159_p0)   ;;  %v1487_v54 = vld [vmem:[#allocation10 + $0x8] sm:$0xff] (!%p1159_p0)   ;;  %v1488_v55 = vld [vmem:[#allocation10 + $0x10] sm:$0xff] (!%p1159_p0)   ;;  %s2394_s28 = sld [smem:[#allocation34_spill]] (!%p1159_p0)  ;;  %s1178_s19 = sld [smem:[#allocation3 + $0x1]] (!%p1159_p0) }
  0xf0   : > { %vm443_vm0 = vcmp.lt.s32.totalorder %v439_v4, %v442_v5  ;;  %v1489_v56 = vld [vmem:[#allocation10 + $0x18] sm:$0xff] (!%p1159_p0)   ;;  %v1490_v60 = vld [vmem:[#allocation10 + $0x20] sm:$0xff] (!%p1159_p0)   ;;  %v1495_v62 = vld [vmem:[#allocation11 + $0x8] sm:$0xff] (!%p1159_p0)   ;;  %s2395_s21 = sld [smem:[#allocation35_spill]] (!%p1159_p0) }
  0xf1   : > { %vm444_vm1 = vmpackc.low %vm443_vm0, %vm443_vm0  ;;  %1232 = vmatpush3.bf16.msra.mxu0 %v1480_v6  ;;  %1309 = vmatpush3.bf16.msra.mxu1 %v1480_v6  ;;  %v1494_v61 = vld [vmem:[#allocation11] sm:$0xff] (!%p1159_p0)   ;;  %v1491_v63 = vld [vmem:[#allocation10 + $0x28] sm:$0xff] (!%p1159_p0)  }
  0xf2   : > { %v445_v14 = vsel %vm444_vm1, 65537, %v1804_v13  ;;  %1233 = vmatprep.subr.bf16.mxu0 %v1481_v9  ;;  %1302 = vmatprep.subr.bf16.mxu1 %v1481_v9  ;;  %v1496_v0 = vld [vmem:[#allocation11 + $0x10] sm:$0xff] (!%p1159_p0)   ;;  %v1497_v1 = vld [vmem:[#allocation11 + $0x18] sm:$0xff] (!%p1159_p0)   ;;  %v1498_v3 = vld [vmem:[#allocation11 + $0x20] sm:$0xff] (!%p1159_p0)  }
  0xf3   : > { %v449_v17 = vrot.slane %v445_v14, %v448_v8  ;;  %v1492_v2 = vld [vmem:[#allocation10 + $0x30] sm:$0xff] (!%p1159_p0)   ;;  %v1493_v4 = vld [vmem:[#allocation10 + $0x38] sm:$0xff] (!%p1159_p0)   ;;  %v1499_v14 = vld [vmem:[#allocation11 + $0x28] sm:$0xff] (!%p1159_p0)  }
  0xf4   : > { %v1500_v15 = vld [vmem:[#allocation11 + $0x30] sm:$0xff] (!%p1159_p0)   ;;  %v1501_v16 = vld [vmem:[#allocation11 + $0x38] sm:$0xff] (!%p1159_p0)  }
  0xf5   : > { %vm450_vm2 = vcmp.ne.s16.totalorder %v449_v17, 0  ;;  %1234 = vmatpush3.bf16.msra.mxu0 %v1481_v9  ;;  %1310 = vmatpush3.bf16.msra.mxu1 %v1481_v9  ;;  %v1160_v17 = vld [vmem:[%s2394_s28] ss:$0 sm:$0xff] (!%p1159_p0) }
  0xf6   : > { %1243 = vmatprep.mubr.msk.bf16.mxu0 %vm450_vm2, %v434_v12  ;;  %1247 = vmatprep.mubr.msk.bf16.mxu1 %vm450_vm2, %v436_v18 }
  0xf7   : > { %1235 = vmatprep.subr.bf16.mxu0 %v1482_v19  ;;  %1303 = vmatprep.subr.bf16.mxu1 %v1482_v19 }
  0xf9   : > { %1236 = vmatpush3.bf16.msra.mxu0 %v1482_v19  ;;  %1311 = vmatpush3.bf16.msra.mxu1 %v1482_v19  ;;  %v769_v19 = vstv (!%p1159_p0), %s768_s7 }
  0xfa   : > { %1237 = vmatprep.subr.bf16.mxu0 %v1483_v20  ;;  %1304 = vmatprep.subr.bf16.mxu1 %v1483_v20 }
  0xfd   : > { %1238 = vmatpush3.bf16.msra.mxu0 %v1483_v20  ;;  %1312 = vmatpush3.bf16.msra.mxu1 %v1483_v20 }
  0xfe   : > { %1239 = vmatprep.subr.bf16.mxu0 %v1484_v21  ;;  %1305 = vmatprep.subr.bf16.mxu1 %v1484_v21 }
 0x101   : > { %1240 = vmatpush3.bf16.msra.mxu0 %v1484_v21  ;;  %1313 = vmatpush3.bf16.msra.mxu1 %v1484_v21 }
 0x102   : > { %1241 = vmatprep.subr.bf16.mxu0 %v1485_v22  ;;  %1306 = vmatprep.subr.bf16.mxu1 %v1485_v22 }
 0x105   : > { %1242 = vmatpush3.bf16.msra.mxu0 %v1485_v22  ;;  %1314 = vmatpush3.bf16.msra.mxu1 %v1485_v22 }
 0x106   : > { %1251 = vmatprep.subr.bf16.mxu0 (!%p1159_p0), %v1486_v53  ;;  %1275 = vmatprep.subr.bf16.mxu1 (!%p1159_p0), %v1494_v61 }
 0x108   : > { %1244 = vmatmul.mubr.msk.bf16.vlgmr.msra.gmra.mrb[0].mxu0 %vm450_vm2, %v435_v27  ;;  %1248 = vmatmul.mubr.msk.bf16.vlgmr.msra.gmra.mrb[0].mxu1 %vm450_vm2, %v437_v28 }
 0x109   : > { %1252 = vmatpush3.bf16.msra.mxu0 (!%p1159_p0), %v1486_v53  ;;  %1276 = vmatpush3.bf16.msra.mxu1 (!%p1159_p0), %v1494_v61 }
 0x10a   : > { %1253 = vmatprep.subr.bf16.mxu0 (!%p1159_p0), %v1487_v54  ;;  %1277 = vmatprep.subr.bf16.mxu1 (!%p1159_p0), %v1495_v62 }
 0x10d   : > { %1254 = vmatpush3.bf16.msra.mxu0 (!%p1159_p0), %v1487_v54  ;;  %1278 = vmatpush3.bf16.msra.mxu1 (!%p1159_p0), %v1495_v62 }
 0x10e   : > { %1255 = vmatprep.subr.bf16.mxu0 (!%p1159_p0), %v1488_v55  ;;  %1279 = vmatprep.subr.bf16.mxu1 (!%p1159_p0), %v1496_v0 }
 0x111   : > { %1256 = vmatpush3.bf16.msra.mxu0 (!%p1159_p0), %v1488_v55  ;;  %1280 = vmatpush3.bf16.msra.mxu1 (!%p1159_p0), %v1496_v0  ;;  %v1169_v55 = vld [vmem:[%s2395_s21] ss:$0 sm:$0xff] (!%p1159_p0) }
 0x112   : > { %1257 = vmatprep.subr.bf16.mxu0 (!%p1159_p0), %v1489_v56  ;;  %1281 = vmatprep.subr.bf16.mxu1 (!%p1159_p0), %v1497_v1 }
 0x115   : > { %1258 = vmatpush3.bf16.msra.mxu0 (!%p1159_p0), %v1489_v56  ;;  %1282 = vmatpush3.bf16.msra.mxu1 (!%p1159_p0), %v1497_v1 }
 0x116   : > { %1259 = vmatprep.subr.bf16.mxu0 (!%p1159_p0), %v1490_v60  ;;  %1283 = vmatprep.subr.bf16.mxu1 (!%p1159_p0), %v1498_v3 }
 0x119   : > { %1260 = vmatpush3.bf16.msra.mxu0 (!%p1159_p0), %v1490_v60  ;;  %1284 = vmatpush3.bf16.msra.mxu1 (!%p1159_p0), %v1498_v3 }
 0x11a   : > { %1261 = vmatprep.subr.bf16.mxu0 (!%p1159_p0), %v1491_v63  ;;  %1285 = vmatprep.subr.bf16.mxu1 (!%p1159_p0), %v1499_v14 }
 0x11d   : > { %1262 = vmatpush3.bf16.msra.mxu0 (!%p1159_p0), %v1491_v63  ;;  %1286 = vmatpush3.bf16.msra.mxu1 (!%p1159_p0), %v1499_v14 }
 0x11e   : > { %1263 = vmatprep.subr.bf16.mxu0 (!%p1159_p0), %v1492_v2  ;;  %1287 = vmatprep.subr.bf16.mxu1 (!%p1159_p0), %v1500_v15 }
 0x121   : > { %1264 = vmatpush3.bf16.msra.mxu0 (!%p1159_p0), %v1492_v2  ;;  %1288 = vmatpush3.bf16.msra.mxu1 (!%p1159_p0), %v1500_v15 }
 0x122   : > { %1265 = vmatprep.subr.bf16.mxu0 (!%p1159_p0), %v1493_v4  ;;  %1289 = vmatprep.subr.bf16.mxu1 (!%p1159_p0), %v1501_v16 }
 0x125   : > { %1266 = vmatpush3.bf16.msra.mxu0 (!%p1159_p0), %v1493_v4  ;;  %1290 = vmatpush3.bf16.msra.mxu1 (!%p1159_p0), %v1501_v16 }
 0x1db   : > { %v1245_v33 = vpop.f32.mrb[0].mxu0  ;;  %v1249_v34 = vpop.f32.mrb[0].mxu1  ;;  %611 = sbr.rel (%p1159_p0) target bundleno = 944 (0x3b0), region = 76 }
 0x1dc   : > { %v594_v37 = vadd.f32 %v1245_v33, %v457_v29  ;;  %v598_v38 = vadd.f32 %v1249_v34, %v461_v30  ;;  %v561_v39 = vpop.f32.mrb[1].mxu0  ;;  %v577_v40 = vpop.f32.mrb[1].mxu1 }
 0x1dd   : > { %v592_v43 = vadd.f32 %v561_v39, %v455_v31  ;;  %v596_v44 = vadd.f32 %v577_v40, %v459_v32  ;;  %v1246_v45 = vpop.f32.mrb[2].mxu0  ;;  %v1250_v46 = vpop.f32.mrb[2].mxu1 }
 0x1de   : > { %602 = vst [vmem:[#allocation2 + $0x10] sm:$0xff] %v594_v37  ;;  %606 = vst [vmem:[#allocation2 + $0x30] sm:$0xff] %v598_v38  ;;  %v595_v47 = vadd.f32 %v1246_v45, %v458_v35  ;;  %v599_v48 = vadd.f32 %v1250_v46, %v462_v36  ;;  %v564_v49 = vpop.f32.mrb[3].mxu0  ;;  %v580_v50 = vpop.f32.mrb[3].mxu1 }
 0x1df   : > { %600 = vst [vmem:[#allocation2] sm:$0xff] %v592_v43  ;;  %604 = vst [vmem:[#allocation2 + $0x20] sm:$0xff] %v596_v44  ;;  %v593_v51 = vadd.f32 %v564_v49, %v456_v41  ;;  %v597_v52 = vadd.f32 %v580_v50, %v460_v42 }
 0x1e0   : > { %603 = vst [vmem:[#allocation2 + $0x18] sm:$0xff] %v595_v47  ;;  %607 = vst [vmem:[#allocation2 + $0x38] sm:$0xff] %v599_v48 }
 0x1e1   : > { %601 = vst [vmem:[#allocation2 + $0x8] sm:$0xff] %v593_v51  ;;  %605 = vst [vmem:[#allocation2 + $0x28] sm:$0xff] %v597_v52 }
 0x1e5   : > { %v614_v5 = vld [vmem:[#allocation2 + $0x10] sm:$0xff] }
 0x1e6   : > { %v612_v57 = vld [vmem:[#allocation2] sm:$0xff]  ;;  %v618_v11 = vld [vmem:[#allocation2 + $0x30] sm:$0xff] }
 0x1e7   : > { %v615_v6 = vld [vmem:[#allocation2 + $0x18] sm:$0xff]  ;;  %v616_v7 = vld [vmem:[#allocation2 + $0x20] sm:$0xff] }
 0x1e8   : > { %v613_v58 = vld [vmem:[#allocation2 + $0x8] sm:$0xff]  ;;  %v621_v9 = vpack.c.bf16 %v615_v6, %v614_v5  ;;  %v619_v12 = vld [vmem:[#allocation2 + $0x38] sm:$0xff] }
 0x1e9   : > { %v620_v59 = vpack.c.bf16 %v613_v58, %v612_v57  ;;  %v617_v8 = vld [vmem:[#allocation2 + $0x28] sm:$0xff]  ;;  %v623_v13 = vpack.c.bf16 %v619_v12, %v618_v11  ;;  %v935_v57 = vstv %s1178_s19 }
 0x1ea   : > { %v622_v10 = vpack.c.bf16 %v617_v8, %v616_v7 }
 0x1eb   : > { %1267 = vmatprep.mubr.bf16.mxu0 %v620_v59 }
 0x1ec   : > { %1268 = vmatmul.mubr.bf16.vlgmr.msra.gmra.mrb[0].mxu0 %v621_v9 }
 0x1ed   : > { %1271 = vmatprep.mubr.bf16.mxu0 %v622_v10 }
 0x1f4   : > { %1272 = vmatmul.mubr.bf16.gmra.mrb[4].mxu0 %v623_v13 }
 0x2bf   : > { %v1269_v18 = vpop.f32.mrb[0].mxu0 }
 0x2c0   : > { %v738_v20 = vadd.f32 %v1269_v18, %v1160_v17  ;;  %v729_v21 = vpop.f32.mrb[1].mxu0 }
 0x2c1   : > { %v730_v22 = vadd.f32 %v1160_v17, %v729_v21  ;;  %v1270_v23 = vpop.f32.mrb[2].mxu0 }
 0x2c2   : > { %v772_v24 = vmul.f32 %v769_v19, %v738_v20  ;;  %v741_v25 = vadd.f32 %v1270_v23, %v1160_v17  ;;  %v732_v26 = vpop.f32.mrb[3].mxu0  ;;  %vm762_vm3 = vcmp.gt.f32.partialorder %v738_v20, 0.0 }
 0x2c3   : > { %v770_v27 = vmul.f32 %v769_v19, %v730_v22  ;;  %v733_v28 = vadd.f32 %v1160_v17, %v732_v26  ;;  %vm760_vm5 = vcmp.gt.f32.partialorder %v730_v22, 0.0 }
 0x2c4   : > { %vm763_vm4 = vcmp.gt.f32.partialorder %v741_v25, 0.0  ;;  %v773_v29 = vmul.f32 %v769_v19, %v741_v25  ;;  %v780_v31 = vsel %vm762_vm3, %v738_v20, %v772_v24 }
 0x2c5   : > { %v771_v30 = vmul.f32 %v769_v19, %v733_v28  ;;  %vm761_vm6 = vcmp.gt.f32.partialorder %v733_v28, 0.0  ;;  %v778_v34 = vsel %vm760_vm5, %v730_v22, %v770_v27 }
 0x2c6   : > { %v781_v32 = vsel %vm763_vm4, %v741_v25, %v773_v29 }
 0x2c7   : > { %v1273_v33 = vpop.f32.mrb[4].mxu0  ;;  %v779_v35 = vsel %vm761_vm6, %v733_v28, %v771_v30  ;;  %v787_v36 = vpack.c.bf16 %v781_v32, %v780_v31 }
 0x2c8   : > { %v754_v37 = vadd.f32 %v1273_v33, %v1160_v17  ;;  %v745_v38 = vpop.f32.mrb[5].mxu0  ;;  %v786_v39 = vpack.c.bf16 %v779_v35, %v778_v34 }
 0x2c9   : > { %v746_v40 = vadd.f32 %v1160_v17, %v745_v38  ;;  %v1274_v41 = vpop.f32.mrb[6].mxu0 }
 0x2ca   : > { %v776_v42 = vmul.f32 %v769_v19, %v754_v37  ;;  %v757_v43 = vadd.f32 %v1274_v41, %v1160_v17  ;;  %v748_v44 = vpop.f32.mrb[7].mxu0  ;;  %1291 = vmatprep.mubr.bf16.mxu1 %v786_v39  ;;  %vm766_vm7 = vcmp.gt.f32.partialorder %v754_v37, 0.0 }
 0x2cb   : > { %v774_v45 = vmul.f32 %v769_v19, %v746_v40  ;;  %v749_v46 = vadd.f32 %v1160_v17, %v748_v44  ;;  %1292 = vmatmul.mubr.bf16.vlgmr.msra.gmra.mrb[0].mxu1 %v787_v36  ;;  %vm764_vm8 = vcmp.gt.f32.partialorder %v746_v40, 0.0 }
 0x2cc   : > { %vm767_vm9 = vcmp.gt.f32.partialorder %v757_v43, 0.0  ;;  %v777_v47 = vmul.f32 %v769_v19, %v757_v43  ;;  %v784_v49 = vsel %vm766_vm7, %v754_v37, %v776_v42 }
 0x2cd   : > { %vm765_vm10 = vcmp.gt.f32.partialorder %v749_v46, 0.0  ;;  %v775_v48 = vmul.f32 %v769_v19, %v749_v46  ;;  %v782_v51 = vsel %vm764_vm8, %v746_v40, %v774_v45 }
 0x2ce   : > { %v785_v50 = vsel %vm767_vm9, %v757_v43, %v777_v47 }
 0x2cf   : > { %v783_v52 = vsel %vm765_vm10, %v749_v46, %v775_v48  ;;  %v789_v53 = vpack.c.bf16 %v785_v50, %v784_v49 }
 0x2d0   : > { %v788_v54 = vpack.c.bf16 %v783_v52, %v782_v51 }
 0x2d2   : > { %1295 = vmatprep.mubr.bf16.mxu1 %v788_v54 }
 0x2d3   : > { %1296 = vmatmul.mubr.bf16.gmra.mrb[4].mxu1 %v789_v53 }
 0x39e   : > { %v1293_v56 = vpop.f32.mrb[0].mxu1 }
 0x39f   : > { %v904_v58 = vadd.f32 %v1293_v56, %v1169_v55  ;;  %v895_v59 = vpop.f32.mrb[1].mxu1 }
 0x3a0   : > { %v896_v60 = vadd.f32 %v1169_v55, %v895_v59  ;;  %v1294_v61 = vpop.f32.mrb[2].mxu1 }
 0x3a1   : > { %vm928_vm11 = vcmp.gt.f32.partialorder %v904_v58, 0.0  ;;  %v938_v62 = vmul.f32 %v935_v57, %v904_v58  ;;  %v907_v63 = vadd.f32 %v1294_v61, %v1169_v55  ;;  %v898_v0 = vpop.f32.mrb[3].mxu1 }
 0x3a2   : > { %vm926_vm12 = vcmp.gt.f32.partialorder %v896_v60, 0.0  ;;  %v936_v1 = vmul.f32 %v935_v57, %v896_v60  ;;  %v899_v2 = vadd.f32 %v1169_v55, %v898_v0 }
 0x3a3   : > { %v946_v3 = vsel %vm928_vm11, %v904_v58, %v938_v62  ;;  %vm929_vm13 = vcmp.gt.f32.partialorder %v907_v63, 0.0  ;;  %v939_v4 = vmul.f32 %v935_v57, %v907_v63 }
 0x3a4   : > { %954 = vst [vmem:[%s2189_s26 + $0x10] sm:$0xff] %v946_v3  ;;  %v944_v5 = vsel %vm926_vm12, %v896_v60, %v936_v1  ;;  %vm927_vm14 = vcmp.gt.f32.partialorder %v899_v2, 0.0  ;;  %v937_v6 = vmul.f32 %v935_v57, %v899_v2 }
 0x3a5   : > { %952 = vst [vmem:[%s2189_s26] sm:$0xff] %v944_v5  ;;  %v947_v7 = vsel %vm929_vm13, %v907_v63, %v939_v4 }
 0x3a6   : > { %955 = vst [vmem:[%s2189_s26 + $0x18] sm:$0xff] %v947_v7  ;;  %v945_v8 = vsel %vm927_vm14, %v899_v2, %v937_v6  ;;  %v1297_v9 = vpop.f32.mrb[4].mxu1 }
 0x3a7   : > { %953 = vst [vmem:[%s2189_s26 + $0x8] sm:$0xff] %v945_v8  ;;  %v920_v10 = vadd.f32 %v1297_v9, %v1169_v55  ;;  %v911_v11 = vpop.f32.mrb[5].mxu1 }
 0x3a8   : > { %v912_v12 = vadd.f32 %v1169_v55, %v911_v11  ;;  %v1298_v13 = vpop.f32.mrb[6].mxu1 }
 0x3a9   : > { %vm932_vm15 = vcmp.gt.f32.partialorder %v920_v10, 0.0  ;;  %v942_v14 = vmul.f32 %v935_v57, %v920_v10  ;;  %v923_v15 = vadd.f32 %v1298_v13, %v1169_v55  ;;  %v914_v16 = vpop.f32.mrb[7].mxu1 }
 0x3aa   : > { %vm930_vm0 = vcmp.gt.f32.partialorder %v912_v12, 0.0  ;;  %v940_v17 = vmul.f32 %v935_v57, %v912_v12  ;;  %v915_v18 = vadd.f32 %v1169_v55, %v914_v16 }
 0x3ab   : > { %v950_v19 = vsel %vm932_vm15, %v920_v10, %v942_v14  ;;  %vm933_vm1 = vcmp.gt.f32.partialorder %v923_v15, 0.0  ;;  %v943_v20 = vmul.f32 %v935_v57, %v923_v15 }
 0x3ac   : > { %958 = vst [vmem:[%s2189_s26 + $0x30] sm:$0xff] %v950_v19  ;;  %v948_v21 = vsel %vm930_vm0, %v912_v12, %v940_v17  ;;  %vm931_vm2 = vcmp.gt.f32.partialorder %v915_v18, 0.0  ;;  %v941_v22 = vmul.f32 %v935_v57, %v915_v18 }
 0x3ad   : > { %956 = vst [vmem:[%s2189_s26 + $0x20] sm:$0xff] %v948_v21  ;;  %v951_v23 = vsel %vm933_vm1, %v923_v15, %v943_v20 }
 0x3ae   : > { %959 = vst [vmem:[%s2189_s26 + $0x38] sm:$0xff] %v951_v23  ;;  %v949_v24 = vsel %vm931_vm2, %v915_v18, %v941_v22 }
 0x3af   : > { %957 = vst [vmem:[%s2189_s26 + $0x28] sm:$0xff] %v949_v24 }
 0x3b0 PF: > { %s2230_s4 = scalar_lea.sflag [#allocation5], %s397_s10  ;;  %s2397_s11 = sld [smem:[#allocation32_spill]] }
 0x3b6   : > { %p2398_p3 = scmp.ne.s32.totalorder %s2397_s11, 0 }
 0x3b7   : > { %s2399_s18 = sld [smem:[#allocation25_spill]] (%p2398_p3) }
 0x3b8   : > { %967 = sbr.rel (!%p2398_p3) target bundleno = 990 (0x3de), region = 80 }
 0x3bd   : > { %s1180_s22 = sshll.u32 (%p2398_p3), %s2399_s18, 3 }
 0x3be   : > { %s969_s20 = ssub.s32 (%p2398_p3), 25, %s1180_s22 }
 0x3bf   : > { %p970_p10 = scmp.lt.s32.totalorder %s969_s20, 8 }
 0x3c1   : > { %s2431_s20 = smov (!%p970_p10, %s969_s20), 8 }
 0x3c2   : > { %s2235_s24 = sshll.u32 %s2431_s20, 7 }
 0x3c3   : > { %s974_s15 = ssub.s32 1024, %s2235_s24 }
 0x3c4   : > { %975 = vsyncadd %s2230_s4, %s974_s15  ;;  %p1182_p2 = scmp.ne.s32.totalorder %s2235_s24, 0  ;;  %s1190_s10 = sshll.u32 %s2399_s18, 10 }
 0x3c5   : > { %s2400_s7 = sld [smem:[#allocation36_spill]]  ;;  %s980_s25 = sshll.u32 %s2189_s26, 4  ;;  %s2247_s25 = int_to_ptr.vmem [resolvable:$true] %s980_s25 }
 0x3c6   : > { %s1627_s28 = scalar_lea.vmem %s2247_s25, %s2235_s24  ;;  %s1805_s19 = smov [#allocation13]  }
 0x3c7   : > { %p1628_p1 = scmp.ne.s32.totalorder %s2247_s25, %s1627_s28  ;;  %s1631_s17 = sshll.u32 %s1805_s19, 4  ;;  %s1632_s17 = int_to_ptr.vmem [resolvable:$false] %s1631_s17 }
 0x3c8   : > { %s1633_s30 = scalar_lea.vmem %s1632_s17, 2048  ;;  %p1634_p8 = scmp.lt.s32.totalorder %s2247_s25, %s1632_s17 }
 0x3c9   : > { %p1629_p9 = pnand %p1628_p1, %p1182_p2  ;;  %p1635_p12 = scmp.lt.s32.totalorder %s1633_s30, %s1627_s28 }
 0x3cb   : > { %s2244_s6 = scalar_lea.hbm %s2400_s7, %s1190_s10  ;;  %p1630_p6 = pneg %p1629_p9 }
 0x3cc   : > { %p1636_p13 = por %p1635_p12, %p1634_p8 }
 0x3ce   : > { %p1637_p5 = pnand %p1636_p13, %p1630_p6 }
 0x3d0   : > { %1640 = shalt.err (!%p1637_p5)
}
 0x3d1   : > { %s1641_s26 = scalar_lea.hbm %s2244_s6, %s2235_s24  ;;  %s1645_s11 = scalar_lea.hbm %s2400_s7, 3200 }
 0x3d2   : > { %p1642_p4 = scmp.ne.s32.totalorder %s2244_s6, %s1641_s26  ;;  %p1646_p0 = scmp.lt.u32.totalorder %s2244_s6, %s2400_s7 }
 0x3d3   : > { %p1647_p3 = scmp.lt.u32.totalorder %s1645_s11, %s1641_s26  ;;  %p1649_p1 = scmp.lt.u32.totalorder %s1641_s26, %s2244_s6 }
 0x3d4   : > { %p1643_p7 = pnand %p1642_p4, %p1182_p2 }
 0x3d5   : > { %p1648_p10 = por %p1647_p3, %p1646_p0 }
 0x3d6   : > { %p1644_p11 = pneg %p1643_p7 }
 0x3d7   : > { %p1650_p9 = por %p1649_p1, %p1648_p10 }
 0x3d9   : > { %p1651_p6 = pnand %p1650_p9, %p1644_p11 }
 0x3db   : > { %1654 = shalt.err (!%p1651_p6)
}
 0x3dc   : > { %s1806_s20 = smov 128   ;;  %s1807_s15 = smov 8  }
 0x3dd   : > { %986 = dma.vmem_to_hbm [thread:$0]  (%p1182_p2), %s2247_s25, %s2235_s24, %s2244_s6, %s2230_s4, %s1806_s20, %s1806_s20, %s1807_s15  }
 0x3de PF: > { %s2401_s10 = sld [smem:[#allocation20_spill]]  ;;  %s2402_s27 = sld [smem:[#allocation33_spill]] }
 0x3df   : > { %p1351_p8 = scmp.ge.s32.totalorder %s1789_s14, 2 }
 0x3e4   : > { %s995_s23 = sand.u32 1, %s2401_s10   ;;  %p2403_p12 = scmp.ne.s32.totalorder %s2402_s27, 0 }
 0x3e5   : > { %s996_s28 = scalar_lea.sflag [#allocation5], %s995_s23 }
 0x3e6   : > { %p1342_p13 = pnand %p1351_p8, %p2403_p12 }
 0x3e8   : > { %1732 = dma.done.wait (!%p1342_p13), %s996_s28, 1024  }
 0x3e9   : > { %1734 = vsyncadd (!%p1342_p13), %s996_s28, 4294966272  ;;  %s28_s14 = sadd.s32 1, %s1789_s14   ;;  %s2405_s24 = sld [smem:[#allocation21_spill]] }
 0x3ea   : > { %p2279_p5 = scmp.ge.s32.totalorder %s28_s14, 10   ;;  %s2406_s25 = sld [smem:[#allocation22_spill]] }
 0x3eb   : > { %s2407_s26 = sld [smem:[#allocation31_spill]]  ;;  %s2408_s27 = sld [smem:[#allocation23_spill]] }
 0x3ec   : > { %s2409_s4 = sld [smem:[#allocation28_spill]]  ;;  %s2410_s6 = sld [smem:[#allocation29_spill]] }
 0x3ed   : > { %s2411_s17 = sld [smem:[#allocation26_spill]]  ;;  %s2412_s21 = sld [smem:[#allocation27_spill]] }
 0x3ee   : > { %s2413_s28 = smov %s1757_s29  ;;  %s2415_s30 = smov %s1765_s8 }
 0x3ef   : > { %s2416_s8 = smov %s1769_s9  ;;  %s2418_s10 = smov %s1781_s12 }
 0x3f0   : > { %s2419_s11 = smov %s1785_s13  ;;  %27 = sbr.rel (!%p2279_p5) target bundleno = 18 (0x12), region = 127 }
 0x3f2   : > { %s2414_s29 = smov %s2409_s4  ;;  %s2417_s9 = smov %s2410_s6 }
 0x3f3   : > { %s2420_s12 = smov %s2411_s17  ;;  %s2421_s13 = smov %s2412_s21 }
 0x3f7   :  { %1001 = vsyncpa [#allocation4], 1 }
 0x3f8   :  { %1003 = vsyncpa [#allocation4 + $0x1], 1 }
 0x3f9   :  { %1004 = vsyncpa [#allocation9], 1 }
 0x3fa   :  { %1006 = vsyncpa [#allocation9 + $0x1], 1 }
 0x3fb   :  { %1007 = vsyncpa [#allocation12], 1 }
 0x3fc   :  { %1008 = vsyncpa [#allocation5], 1 }
 0x3fd   :  { %1010 = vsyncpa [#allocation5 + $0x1], 1 }
 0x3fe   :  { %1011 = vsyncpa [#allocation6], 1 }
 0x3ff   :  { %1013 = vsyncpa [#allocation6 + $0x1], 1 }

</bundles_post_ra>
